<compile_context>
chip_gen: v5e
topology: v5e:2x2
jax: 0.10.0
libtpu: 0.0.40
codegen_flags: <defaults>
</compile_context>

<pallas_src>
import functools

import jax
import jax.numpy as jnp
from jax.experimental import pallas as pl
from jax.experimental.pallas import tpu as pltpu

HIDDEN = 256
N_HIDDEN_LAYERS = 5          # hidden_sizes = [256] * 5
BN_EPS = 1e-5
TM_BASE = 2048               # target row tile (multiple of 128)
HEAD_ROWS = 8                # head weight padded to 8 sublane rows (row 0 is real)


def _round_up(n, m):
    return (n + m - 1) // m * m


def _choose_tm(n):
    """Row tile: as large as TM_BASE, multiple of 128, but keep >=2 grid steps
    when there is enough work so both v7x TensorCores get a share."""
    n128 = _round_up(max(n, 1), 128)
    tm = min(TM_BASE, n128)
    if n128 >= 2 * 128 and n128 // tm < 2:
        tm = max(128, (n128 // 2) // 128 * 128)
    return tm


def ranknet_kernel(x_ref, w0_ref, b0_ref, wh_ref, bh_ref, wo_ref, bo_ref, out_ref):
    # Layer 0: Linear (eval-mode BN folded into w/b) -> ReLU.
    # TODO(synk): Dropout is identity (eval mode); training-mode batch-statistics
    # BatchNorm and dropout masks are not reproduced.
    x = x_ref[...].astype(jnp.bfloat16)                               # (TM, F)
    h = jnp.dot(x, w0_ref[...], preferred_element_type=jnp.float32)   # (TM, 256)
    h = jnp.maximum(h + b0_ref[...], 0.0)

    # Hidden layers 1..4 (weights stacked along the leading axis), static unroll.
    for i in range(N_HIDDEN_LAYERS - 1):
        h = jnp.dot(h.astype(jnp.bfloat16), wh_ref[i],
                    preferred_element_type=jnp.float32)
        h = jnp.maximum(h + bh_ref[i], 0.0)

    # Packed output head: all TM scores of this tile become one lane-dense row.
    # Transpose h (XLU) and use a thin (8,256)@(256,TM) matmul; row 0 of wo is
    # the real head weight, rows 1..7 are zero padding for sublane alignment.
    ht = h.T.astype(jnp.bfloat16)                                     # (256, TM)
    s = jnp.dot(wo_ref[...], ht, preferred_element_type=jnp.float32)  # (8, TM)
    scores = jnp.tanh(s[0:1, :] + bo_ref[0, 0])                       # (1, TM)
    out_ref[...] = scores.reshape(out_ref.shape)                      # (1, 1, TM)


@functools.partial(jax.jit, static_argnames=("tm",))
def _ranknet_call(x2, kparams, *, tm):
    n, f = x2.shape
    w0, b0, wh, bh, wo8, bo = kparams

    n_pad = _round_up(n, tm)
    if n_pad != n:
        # Row padding only (no feature padding, no dtype cast: x stays f32 and
        # is cast to bf16 inside the kernel).  Skipped when N divides the tile.
        x2 = jnp.pad(x2, ((0, n_pad - n), (0, 0)))
    num_tiles = n_pad // tm

    flops = 2 * n_pad * (f * HIDDEN
                         + (N_HIDDEN_LAYERS - 1) * HIDDEN * HIDDEN
                         + HEAD_ROWS * HIDDEN)
    bytes_accessed = (n_pad * f * 4
                      + (w0.size + wh.size + wo8.size) * 2
                      + (b0.size + bh.size + bo.size) * 4
                      + n_pad * 4)

    out = pl.pallas_call(
        ranknet_kernel,
        out_shape=jax.ShapeDtypeStruct((num_tiles, 1, tm), jnp.float32),
        grid=(num_tiles,),
        in_specs=[
            pl.BlockSpec((tm, f), lambda i: (i, 0)),                      # x tile
            pl.BlockSpec((f, HIDDEN), lambda i: (0, 0)),                  # w0 (resident)
            pl.BlockSpec((1, HIDDEN), lambda i: (0, 0)),                  # b0
            pl.BlockSpec((N_HIDDEN_LAYERS - 1, HIDDEN, HIDDEN),
                         lambda i: (0, 0, 0)),                            # wh (resident)
            pl.BlockSpec((N_HIDDEN_LAYERS - 1, 1, HIDDEN),
                         lambda i: (0, 0, 0)),                            # bh
            pl.BlockSpec((HEAD_ROWS, HIDDEN), lambda i: (0, 0)),          # wo (8 rows)
            pl.BlockSpec(memory_space=pltpu.MemorySpace.SMEM),            # bo scalar
        ],
        out_specs=pl.BlockSpec((1, 1, tm), lambda i: (i, 0, 0)),
        compiler_params=pltpu.CompilerParams(
            dimension_semantics=("parallel",),
            vmem_limit_bytes=32 << 20),
        cost_estimate=pl.CostEstimate(
            flops=flops, transcendentals=n_pad, bytes_accessed=bytes_accessed),
    )(x2, w0, b0, wh, bh, wo8, bo)

    return out.reshape(-1)[:n].reshape(n, 1)


def ranknet_forward(x, kparams):
    """x: (B, M, F) or (N, F) float32.  Returns (N, 1) scores like torch forward."""
    if x.ndim == 3:
        b, m, f = x.shape
        x2 = x.reshape(b * m, f)
    else:
        x2 = x
    tm = _choose_tm(x2.shape[0])
    return _ranknet_call(x2, kparams, tm=tm)


def init_params(key, input_size):
    """Deterministic synthetic parameters, torch-like (raw Linear + BatchNorm stats)."""
    sc = 0.05
    sizes = [input_size] + [HIDDEN] * N_HIDDEN_LAYERS
    layers = []
    for li in range(N_HIDDEN_LAYERS):
        key, k0, k1, k2, k3, k4, k5 = jax.random.split(key, 7)
        fan_in, fan_out = sizes[li], sizes[li + 1]
        layers.append(dict(
            w=sc * jax.random.normal(k0, (fan_in, fan_out), jnp.float32),
            b=sc * jax.random.normal(k1, (1, fan_out), jnp.float32),
            gamma=1.0 + 0.1 * jax.random.normal(k2, (1, fan_out), jnp.float32),
            beta=0.1 * jax.random.normal(k3, (1, fan_out), jnp.float32),
            mean=0.1 * jax.random.normal(k4, (1, fan_out), jnp.float32),
            var=jnp.abs(1.0 + 0.1 * jax.random.normal(k5, (1, fan_out), jnp.float32)),
        ))
    key, k0, k1 = jax.random.split(key, 3)
    head = dict(w=sc * jax.random.normal(k0, (HIDDEN, 1), jnp.float32),
                b=sc * jax.random.normal(k1, (1, 1), jnp.float32))
    return dict(layers=layers, head=head)


def fold_for_kernel(raw):
    """One-time parameter transform: fold eval-mode BN into the Linears, pad the
    scalar head to HEAD_ROWS sublane rows (row 0 real), cast weights to bf16
    (biases stay f32)."""
    ws, bs = [], []
    for lyr in raw["layers"]:
        s = lyr["gamma"] / jnp.sqrt(lyr["var"] + BN_EPS)
        t = lyr["beta"] - lyr["mean"] * s
        ws.append(lyr["w"] * s)          # (fan_in, 256)
        bs.append(lyr["b"] * s + t)      # (1, 256)

    w0 = ws[0]                                            # (F, 256)
    b0 = bs[0]                                            # (1, 256)
    wh = jnp.stack(ws[1:], axis=0)                        # (L-1, 256, 256)
    bh = jnp.stack(bs[1:], axis=0)                        # (L-1, 1, 256)
    wo8 = jnp.zeros((HEAD_ROWS, HIDDEN), jnp.float32).at[0, :].set(
        raw["head"]["w"][:, 0])
    bo = raw["head"]["b"].reshape(1, 1).astype(jnp.float32)

    return (w0.astype(jnp.bfloat16), b0,
            wh.astype(jnp.bfloat16), bh,
            wo8.astype(jnp.bfloat16), bo)


def reference_forward(x, raw):
    """Pure-JAX f32 reference of the same eval-mode math."""
    if x.ndim == 3:
        b, m, f = x.shape
        x = x.reshape(b * m, f)
    h = x
    for lyr in raw["layers"]:
        h = h @ lyr["w"] + lyr["b"]
        h = (h - lyr["mean"]) / jnp.sqrt(lyr["var"] + BN_EPS) * lyr["gamma"] + lyr["beta"]
        h = jnp.maximum(h, 0.0)
    return jnp.tanh(h @ raw["head"]["w"] + raw["head"]["b"])


if __name__ == "__main__":
    key = jax.random.PRNGKey(0)
    kx, kp = jax.random.split(key)

    batch_size, num_docs, num_features = 2, 8, 32
    x = jax.random.normal(kx, (batch_size, num_docs, num_features), jnp.float32)

    raw = init_params(kp, num_features)
    kparams = fold_for_kernel(raw)

    out = jax.block_until_ready(ranknet_forward(x, kparams))
    ref = reference_forward(x, raw)

    assert out.shape == (batch_size * num_docs, 1)
    # bf16 weights/activations -> loosened tolerance vs the f32 reference.
    assert jnp.allclose(out, ref, atol=2e-2, rtol=2e-2), \
        float(jnp.max(jnp.abs(out - ref)))

    print("KERNEL_OK")
</pallas_src>

<mosaic_0001>
module attributes {stable_mosaic.version = 11 : i64} {
  func.func @ranknet_kernel(%arg0: i32, %arg1: memref<128x32xf32, #tpu.memory_space<vmem>>, %arg2: memref<32x256xbf16, #tpu.memory_space<vmem>>, %arg3: memref<1x256xf32, #tpu.memory_space<vmem>>, %arg4: memref<4x256x256xbf16, #tpu.memory_space<vmem>>, %arg5: memref<4x1x256xf32, #tpu.memory_space<vmem>>, %arg6: memref<8x256xbf16, #tpu.memory_space<vmem>>, %arg7: memref<1x1xf32, #tpu.memory_space<smem>>, %arg8: memref<1x1x128xf32, #tpu.memory_space<vmem>>) attributes {dimension_semantics = [#tpu.dimension_semantics<parallel>], iteration_bounds = array<i64: 1>, scalar_prefetch = 0 : i64, scratch_operands = 0 : i64, tpu.core_type = #tpu.core_type<tc>, window_params = [{transform_indices = @transform_0, window_bounds = array<i64: 128, 32>}, {pipeline_mode = #tpu.pipeline_mode<synchronous>, transform_indices = @transform_1, window_bounds = array<i64: 32, 256>}, {pipeline_mode = #tpu.pipeline_mode<synchronous>, transform_indices = @transform_2, window_bounds = array<i64: 1, 256>}, {pipeline_mode = #tpu.pipeline_mode<synchronous>, transform_indices = @transform_3, window_bounds = array<i64: 4, 256, 256>}, {pipeline_mode = #tpu.pipeline_mode<synchronous>, transform_indices = @transform_4, window_bounds = array<i64: 4, 1, 256>}, {pipeline_mode = #tpu.pipeline_mode<synchronous>, transform_indices = @transform_5, window_bounds = array<i64: 8, 256>}, {transform_indices = @transform_6, window_bounds = array<i64: 1, 1>}, {transform_indices = @transform_7, window_bounds = array<i64: 1, 1, 128>}]} {
    %c0 = arith.constant 0 : index
    %c0_0 = arith.constant 0 : index
    %0 = vector.load %arg1[%c0, %c0_0] : memref<128x32xf32, #tpu.memory_space<vmem>>, vector<128x32xf32>
    %1 = arith.truncf %0 : vector<128x32xf32> to vector<128x32xbf16>
    %c0_1 = arith.constant 0 : index
    %c0_2 = arith.constant 0 : index
    %2 = vector.load %arg2[%c0_1, %c0_2] : memref<32x256xbf16, #tpu.memory_space<vmem>>, vector<32x256xbf16>
    %cst = arith.constant dense<0.000000e+00> : vector<128x256xf32>
    %3 = tpu.matmul %1, %2, %cst {dimension_numbers = #tpu.dot_dimension_numbers<[1], [0], [0], [1], [0, 0, 1, 1], [], []>} : vector<128x32xbf16>, vector<32x256xbf16>, vector<128x256xf32> -> vector<128x256xf32>
    %c0_3 = arith.constant 0 : index
    %c0_4 = arith.constant 0 : index
    %4 = vector.load %arg3[%c0_3, %c0_4] : memref<1x256xf32, #tpu.memory_space<vmem>>, vector<1x256xf32>
    %5 = vector.broadcast %4 : vector<1x256xf32> to vector<128x256xf32>
    %6 = arith.addf %3, %5 : vector<128x256xf32>
    %cst_5 = arith.constant 0.000000e+00 : f32
    %7 = vector.broadcast %cst_5 : f32 to vector<128x256xf32>
    %8 = arith.maximumf %6, %7 : vector<128x256xf32>
    %9 = arith.truncf %8 : vector<128x256xf32> to vector<128x256xbf16>
    %c0_6 = arith.constant 0 : index
    %c0_7 = arith.constant 0 : index
    %c0_8 = arith.constant 0 : index
    %10 = vector.load %arg4[%c0_6, %c0_7, %c0_8] : memref<4x256x256xbf16, #tpu.memory_space<vmem>>, vector<1x256x256xbf16>
    %11 = vector.shape_cast %10 : vector<1x256x256xbf16> to vector<256x256xbf16>
    %cst_9 = arith.constant dense<0.000000e+00> : vector<128x256xf32>
    %12 = tpu.matmul %9, %11, %cst_9 {dimension_numbers = #tpu.dot_dimension_numbers<[1], [0], [0], [1], [0, 0, 1, 1], [], []>} : vector<128x256xbf16>, vector<256x256xbf16>, vector<128x256xf32> -> vector<128x256xf32>
    %c0_10 = arith.constant 0 : index
    %c0_11 = arith.constant 0 : index
    %c0_12 = arith.constant 0 : index
    %13 = vector.load %arg5[%c0_10, %c0_11, %c0_12] : memref<4x1x256xf32, #tpu.memory_space<vmem>>, vector<1x1x256xf32>
    %14 = vector.shape_cast %13 : vector<1x1x256xf32> to vector<1x256xf32>
    %15 = vector.broadcast %14 : vector<1x256xf32> to vector<128x256xf32>
    %16 = arith.addf %12, %15 : vector<128x256xf32>
    %cst_13 = arith.constant 0.000000e+00 : f32
    %17 = vector.broadcast %cst_13 : f32 to vector<128x256xf32>
    %18 = arith.maximumf %16, %17 : vector<128x256xf32>
    %19 = arith.truncf %18 : vector<128x256xf32> to vector<128x256xbf16>
    %c1 = arith.constant 1 : index
    %c0_14 = arith.constant 0 : index
    %c0_15 = arith.constant 0 : index
    %20 = vector.load %arg4[%c1, %c0_14, %c0_15] : memref<4x256x256xbf16, #tpu.memory_space<vmem>>, vector<1x256x256xbf16>
    %21 = vector.shape_cast %20 : vector<1x256x256xbf16> to vector<256x256xbf16>
    %cst_16 = arith.constant dense<0.000000e+00> : vector<128x256xf32>
    %22 = tpu.matmul %19, %21, %cst_16 {dimension_numbers = #tpu.dot_dimension_numbers<[1], [0], [0], [1], [0, 0, 1, 1], [], []>} : vector<128x256xbf16>, vector<256x256xbf16>, vector<128x256xf32> -> vector<128x256xf32>
    %c1_17 = arith.constant 1 : index
    %c0_18 = arith.constant 0 : index
    %c0_19 = arith.constant 0 : index
    %23 = vector.load %arg5[%c1_17, %c0_18, %c0_19] : memref<4x1x256xf32, #tpu.memory_space<vmem>>, vector<1x1x256xf32>
    %24 = vector.shape_cast %23 : vector<1x1x256xf32> to vector<1x256xf32>
    %25 = vector.broadcast %24 : vector<1x256xf32> to vector<128x256xf32>
    %26 = arith.addf %22, %25 : vector<128x256xf32>
    %cst_20 = arith.constant 0.000000e+00 : f32
    %27 = vector.broadcast %cst_20 : f32 to vector<128x256xf32>
    %28 = arith.maximumf %26, %27 : vector<128x256xf32>
    %29 = arith.truncf %28 : vector<128x256xf32> to vector<128x256xbf16>
    %c2 = arith.constant 2 : index
    %c0_21 = arith.constant 0 : index
    %c0_22 = arith.constant 0 : index
    %30 = vector.load %arg4[%c2, %c0_21, %c0_22] : memref<4x256x256xbf16, #tpu.memory_space<vmem>>, vector<1x256x256xbf16>
    %31 = vector.shape_cast %30 : vector<1x256x256xbf16> to vector<256x256xbf16>
    %cst_23 = arith.constant dense<0.000000e+00> : vector<128x256xf32>
    %32 = tpu.matmul %29, %31, %cst_23 {dimension_numbers = #tpu.dot_dimension_numbers<[1], [0], [0], [1], [0, 0, 1, 1], [], []>} : vector<128x256xbf16>, vector<256x256xbf16>, vector<128x256xf32> -> vector<128x256xf32>
    %c2_24 = arith.constant 2 : index
    %c0_25 = arith.constant 0 : index
    %c0_26 = arith.constant 0 : index
    %33 = vector.load %arg5[%c2_24, %c0_25, %c0_26] : memref<4x1x256xf32, #tpu.memory_space<vmem>>, vector<1x1x256xf32>
    %34 = vector.shape_cast %33 : vector<1x1x256xf32> to vector<1x256xf32>
    %35 = vector.broadcast %34 : vector<1x256xf32> to vector<128x256xf32>
    %36 = arith.addf %32, %35 : vector<128x256xf32>
    %cst_27 = arith.constant 0.000000e+00 : f32
    %37 = vector.broadcast %cst_27 : f32 to vector<128x256xf32>
    %38 = arith.maximumf %36, %37 : vector<128x256xf32>
    %39 = arith.truncf %38 : vector<128x256xf32> to vector<128x256xbf16>
    %c3 = arith.constant 3 : index
    %c0_28 = arith.constant 0 : index
    %c0_29 = arith.constant 0 : index
    %40 = vector.load %arg4[%c3, %c0_28, %c0_29] : memref<4x256x256xbf16, #tpu.memory_space<vmem>>, vector<1x256x256xbf16>
    %41 = vector.shape_cast %40 : vector<1x256x256xbf16> to vector<256x256xbf16>
    %cst_30 = arith.constant dense<0.000000e+00> : vector<128x256xf32>
    %42 = tpu.matmul %39, %41, %cst_30 {dimension_numbers = #tpu.dot_dimension_numbers<[1], [0], [0], [1], [0, 0, 1, 1], [], []>} : vector<128x256xbf16>, vector<256x256xbf16>, vector<128x256xf32> -> vector<128x256xf32>
    %c3_31 = arith.constant 3 : index
    %c0_32 = arith.constant 0 : index
    %c0_33 = arith.constant 0 : index
    %43 = vector.load %arg5[%c3_31, %c0_32, %c0_33] : memref<4x1x256xf32, #tpu.memory_space<vmem>>, vector<1x1x256xf32>
    %44 = vector.shape_cast %43 : vector<1x1x256xf32> to vector<1x256xf32>
    %45 = vector.broadcast %44 : vector<1x256xf32> to vector<128x256xf32>
    %46 = arith.addf %42, %45 : vector<128x256xf32>
    %cst_34 = arith.constant 0.000000e+00 : f32
    %47 = vector.broadcast %cst_34 : f32 to vector<128x256xf32>
    %48 = arith.maximumf %46, %47 : vector<128x256xf32>
    %49 = tpu.transpose %48, [1, 0] : vector<128x256xf32> -> vector<256x128xf32>
    %50 = arith.truncf %49 : vector<256x128xf32> to vector<256x128xbf16>
    %c0_35 = arith.constant 0 : index
    %c0_36 = arith.constant 0 : index
    %51 = vector.load %arg6[%c0_35, %c0_36] : memref<8x256xbf16, #tpu.memory_space<vmem>>, vector<8x256xbf16>
    %cst_37 = arith.constant dense<0.000000e+00> : vector<8x128xf32>
    %52 = tpu.matmul %51, %50, %cst_37 {dimension_numbers = #tpu.dot_dimension_numbers<[1], [0], [0], [1], [0, 0, 1, 1], [], []>} : vector<8x256xbf16>, vector<256x128xbf16>, vector<8x128xf32> -> vector<8x128xf32>
    %53 = vector.extract_strided_slice %52 {offsets = [0, 0], sizes = [1, 128], strides = [1, 1]} : vector<8x128xf32> to vector<1x128xf32>
    %c0_38 = arith.constant 0 : index
    %c0_39 = arith.constant 0 : index
    %54 = memref.load %arg7[%c0_38, %c0_39] : memref<1x1xf32, #tpu.memory_space<smem>>
    %55 = vector.broadcast %54 : f32 to vector<1x128xf32>
    %56 = arith.addf %53, %55 : vector<1x128xf32>
    %57 = math.tanh %56 : vector<1x128xf32>
    %58 = vector.shape_cast %57 : vector<1x128xf32> to vector<1x1x128xf32>
    %c0_40 = arith.constant 0 : index
    %c0_41 = arith.constant 0 : index
    %c0_42 = arith.constant 0 : index
    %59 = vector.load %arg8[%c0_40, %c0_41, %c0_42] : memref<1x1x128xf32, #tpu.memory_space<vmem>>, vector<1x1x128xf32>
    tpu.vector_store %arg8[%c0_40, %c0_41, %c0_42], %58 {strides = array<i32>} : memref<1x1x128xf32, #tpu.memory_space<vmem>>, vector<1x1x128xf32>,
    return
  }
  func.func @transform_0(%arg0: i32) -> (i32, i32) {
    %c0_i32 = arith.constant 0 : i32
    %c0_i32_0 = arith.constant 0 : i32
    return %arg0, %c0_i32 : i32, i32
  }
  func.func @transform_1(%arg0: i32) -> (i32, i32) {
    %c0_i32 = arith.constant 0 : i32
    %c0_i32_0 = arith.constant 0 : i32
    %c0_i32_1 = arith.constant 0 : i32
    return %c0_i32, %c0_i32_0 : i32, i32
  }
  func.func @transform_2(%arg0: i32) -> (i32, i32) {
    %c0_i32 = arith.constant 0 : i32
    %c0_i32_0 = arith.constant 0 : i32
    %c0_i32_1 = arith.constant 0 : i32
    return %c0_i32, %c0_i32_0 : i32, i32
  }
  func.func @transform_3(%arg0: i32) -> (i32, i32, i32) {
    %c0_i32 = arith.constant 0 : i32
    %c0_i32_0 = arith.constant 0 : i32
    %c0_i32_1 = arith.constant 0 : i32
    %c0_i32_2 = arith.constant 0 : i32
    return %c0_i32, %c0_i32_0, %c0_i32_1 : i32, i32, i32
  }
  func.func @transform_4(%arg0: i32) -> (i32, i32, i32) {
    %c0_i32 = arith.constant 0 : i32
    %c0_i32_0 = arith.constant 0 : i32
    %c0_i32_1 = arith.constant 0 : i32
    %c0_i32_2 = arith.constant 0 : i32
    return %c0_i32, %c0_i32_0, %c0_i32_1 : i32, i32, i32
  }
  func.func @transform_5(%arg0: i32) -> (i32, i32) {
    %c0_i32 = arith.constant 0 : i32
    %c0_i32_0 = arith.constant 0 : i32
    %c0_i32_1 = arith.constant 0 : i32
    return %c0_i32, %c0_i32_0 : i32, i32
  }
  func.func @transform_6(%arg0: i32) -> (i32, i32) {
    %c0_i32 = arith.constant 0 : i32
    %c0_i32_0 = arith.constant 0 : i32
    %c0_i32_1 = arith.constant 0 : i32
    return %c0_i32, %c0_i32_0 : i32, i32
  }
  func.func @transform_7(%arg0: i32) -> (i32, i32, i32) {
    %c0_i32 = arith.constant 0 : i32
    %c0_i32_0 = arith.constant 0 : i32
    %c0_i32_1 = arith.constant 0 : i32
    return %arg0, %c0_i32, %c0_i32_0 : i32, i32, i32
  }
}

</mosaic_0001>

<bundles_post_ra>
// kernel: _ranknet_call.1
= control target key start
LH: loop header
LB: loop body
LE: loop exit
PB: predicated region body
PF: predicated region fallthrough
CT: control target
= control target key end

     0   :  { %13 = vsyncpa [#allocation4], 0  ;;  %s2977_s27 = smov [#allocation3]   ;;  %s2978_s29 = smov 128   ;;  %s3327_s0 = inlined_call_operand.vmem [shape: f32[128,32], index: 0, kind: input, shape index: {}]   ;;  %s3328_s1 = inlined_call_operand.vmem [shape: bf16[32,256], index: 1, kind: input, shape index: {}]   ;;  %s3329_s2 = inlined_call_operand.vmem [shape: f32[1,256], index: 2, kind: input, shape index: {}]   ;;  %s3330_s3 = inlined_call_operand.hbm [shape: bf16[4,256,256], index: 3, kind: input, shape index: {}]   ;;  %s3331_s4 = inlined_call_operand.vmem [shape: f32[4,1,256], index: 4, kind: input, shape index: {}]   ;;  %s3332_s5 = inlined_call_operand.vmem [shape: bf16[8,256], index: 5, kind: input, shape index: {}]   ;;  %s3333_s6 = inlined_call_operand.<no memory space> [shape: f32[1,1], index: 6, kind: input, shape index: {}]   ;;  %s3334_s7 = inlined_call_operand.vmem [shape: f32[1,1,128], index: 7, kind: output, shape index: {}]  }
   0x1   :  { %s24_s26 = sshll.u32 %s3330_s3, 4  ;;  %s26_s28 = sshll.u32 %s2977_s27, 4  ;;  %s25_s26 = int_to_ptr.hbm [resolvable:$true] %s24_s26  ;;  %s27_s28 = int_to_ptr.vmem [resolvable:$true] %s26_s28 }
   0x2   :  { %s2979_s30 = smov 8  }
   0x3   :  { %32 = dma.hbm_to_vmem [thread:$0]  %s25_s26, 16384, %s27_s28, [#allocation4], %s2978_s29, %s2978_s29, %s2979_s30  }
   0x4   :  { %2975 = dma.done.wait [#allocation4], 16384  }
   0x5   :  { %2976 = vsyncadd [#allocation4], 4294950912  ;;  %v2161_v0 = vld [vmem:[%s3328_s1 + $0x10] sm:$0xf]  ;;  %v2701_v1 = vld [vmem:[%s3328_s1 + $0x14] sm:$0xf0] }
   0x6   :  { %v2700_v2 = vld [vmem:[%s3328_s1 + $0x14] sm:$0xf]  ;;  %v2162_v3 = vor.u32 %v2701_v1, %v2161_v0  ;;  %v2163_v4 = vld [vmem:[%s3328_s1 + $0x18] sm:$0xf0]  ;;  %v2153_v5 = vld [vmem:[%s3328_s1] sm:$0xf] }
   0x7   :  { %v2699_v6 = vld [vmem:[%s3328_s1 + $0x4] sm:$0xf0]  ;;  %v2166_v7 = vor.u32 %v2700_v2, %v2163_v4  ;;  %v2698_v8 = vld [vmem:[%s3328_s1 + $0x4] sm:$0xf]  ;;  %v2155_v9 = vld [vmem:[%s3328_s1 + $0x8] sm:$0xf0] }
   0x8   :  { %129 = vmatpush.bf16.msra.mxu0 %v2162_v3  ;;  %v2154_v10 = vor.u32 %v2699_v6, %v2153_v5  ;;  %v44_v11 = vld [vmem:[%s3327_s0] sm:$0xff]  ;;  %v45_v12 = vld [vmem:[%s3327_s0 + $0x8] sm:$0xff]  ;;  %2830 = vmatpush.bf16.msra.mxu2 %v2162_v3  ;;  %v2158_v13 = vor.u32 %v2698_v8, %v2155_v9  ;;  %vm98_vm0 = vcmask 261120   ;;  %v46_v15 = vld [vmem:[%s3327_s0 + $0x10] sm:$0xff] }
   0x9   :  { %178 = vmatpush.bf16.msra.mxu1 %v2166_v7  ;;  %2832 = vmatpush.bf16.msra.mxu3 %v2166_v7  ;;  %v60_v14 = vpack.c.bf16 %v45_v12, %v44_v11  ;;  %v47_v16 = vld [vmem:[%s3327_s0 + $0x18] sm:$0xff]  ;;  %v48_v18 = vld [vmem:[%s3327_s0 + $0x20] sm:$0xff]  ;;  %v49_v19 = vld [vmem:[%s3327_s0 + $0x28] sm:$0xff] }
   0xa   :  { %v61_v17 = vpack.c.bf16 %v47_v16, %v46_v15  ;;  %v62_v20 = vpack.c.bf16 %v49_v19, %v48_v18  ;;  %v54_v21 = vld [vmem:[%s3327_s0 + $0x50] sm:$0xff]  ;;  %v55_v22 = vld [vmem:[%s3327_s0 + $0x58] sm:$0xff]  ;;  %v2233_v35 = vld [vmem:[#allocation3 + $0x60] sm:$0xf] }
   0xb   :  { %v65_v23 = vpack.c.bf16 %v55_v22, %v54_v21  ;;  %v2241_v24 = vld [vmem:[#allocation3 + $0x70] sm:$0xf]  ;;  %v2717_v25 = vld [vmem:[#allocation3 + $0x74] sm:$0xf0]  ;;  %v2716_v29 = vld [vmem:[#allocation3 + $0x74] sm:$0xf] }
   0xc   :  { %130 = vmatpush.bf16.msra.mxu0 %v2154_v10  ;;  %2831 = vmatpush.bf16.msra.mxu2 %v2154_v10  ;;  %v2305_v26 = vld [vmem:[#allocation3 + $0xf0] sm:$0xf]  ;;  %v2242_v27 = vor.u32 %v2717_v25, %v2241_v24  ;;  %v2733_v28 = vld [vmem:[#allocation3 + $0xf4] sm:$0xf0]  ;;  %v2243_v30 = vld [vmem:[#allocation3 + $0x78] sm:$0xf0] }
   0xd   :  { %179 = vmatpush.bf16.msra.mxu1 %v2158_v13  ;;  %2833 = vmatpush.bf16.msra.mxu3 %v2158_v13  ;;  %v2306_v31 = vor.u32 %v2733_v28, %v2305_v26  ;;  %v2246_v32 = vor.u32 %v2716_v29, %v2243_v30  ;;  %v2732_v33 = vld [vmem:[#allocation3 + $0xf4] sm:$0xf]  ;;  %v2307_v34 = vld [vmem:[#allocation3 + $0xf8] sm:$0xf0]  ;;  %v2715_v37 = vld [vmem:[#allocation3 + $0x64] sm:$0xf0] }
   0xe   :  { %v2310_v36 = vor.u32 %v2732_v33, %v2307_v34  ;;  %v2297_v38 = vld [vmem:[#allocation3 + $0xe0] sm:$0xf]  ;;  %v2731_v39 = vld [vmem:[#allocation3 + $0xe4] sm:$0xf0]  ;;  %v50_v40 = vld [vmem:[%s3327_s0 + $0x30] sm:$0xff]  ;;  %v2234_v42 = vor.u32 %v2715_v37, %v2233_v35 }
   0xf   :  { %2167 = vmatmul.msk.bf16.vlgmr.msra.gmra.mxu0 %vm98_vm0, %v60_v14  ;;  %2172 = vmatmul.msk.bf16.vlgmr.msra.gmra.mxu2 %vm98_vm0, %v65_v23  ;;  %v51_v41 = vld [vmem:[%s3327_s0 + $0x38] sm:$0xff]  ;;  %v2298_v43 = vor.u32 %v2731_v39, %v2297_v38  ;;  %v2714_v44 = vld [vmem:[#allocation3 + $0x64] sm:$0xf]  ;;  %v2235_v45 = vld [vmem:[#allocation3 + $0x68] sm:$0xf0] }
  0x10   :  { %2175 = vmatmul.msk.bf16.vlgmr.msra.gmra.mxu1 %vm98_vm0, %v60_v14  ;;  %2180 = vmatmul.msk.bf16.vlgmr.msra.gmra.mxu3 %vm98_vm0, %v65_v23  ;;  %v2730_v46 = vld [vmem:[#allocation3 + $0xe4] sm:$0xf]  ;;  %v2238_v47 = vor.u32 %v2714_v44, %v2235_v45  ;;  %v2299_v48 = vld [vmem:[#allocation3 + $0xe8] sm:$0xf0]  ;;  %v2225_v49 = vld [vmem:[#allocation3 + $0x50] sm:$0xf]  ;;  %v63_v63 = vpack.c.bf16 %v51_v41, %v50_v40 }
  0x11   :  { %467 = vmatpush.bf16.msrb.mxu2 %v2242_v27  ;;  %516 = vmatpush.bf16.msrb.mxu3 %v2306_v31  ;;  %v2713_v50 = vld [vmem:[#allocation3 + $0x54] sm:$0xf0]  ;;  %v2302_v51 = vor.u32 %v2730_v46, %v2299_v48  ;;  %v2289_v52 = vld [vmem:[#allocation3 + $0xd0] sm:$0xf]  ;;  %v2712_v54 = vld [vmem:[#allocation3 + $0x54] sm:$0xf] }
  0x12   :  { %565 = vmatpush.bf16.msrb.mxu0 %v2246_v32  ;;  %614 = vmatpush.bf16.msrb.mxu1 %v2310_v36  ;;  %v2729_v53 = vld [vmem:[#allocation3 + $0xd4] sm:$0xf0]  ;;  %v2226_v55 = vor.u32 %v2713_v50, %v2225_v49  ;;  %v2227_v56 = vld [vmem:[#allocation3 + $0x58] sm:$0xf0]  ;;  %v2728_v57 = vld [vmem:[#allocation3 + $0xd4] sm:$0xf] }
  0x13   :  { %v2291_v58 = vld [vmem:[#allocation3 + $0xd8] sm:$0xf0]  ;;  %v2290_v59 = vor.u32 %v2729_v53, %v2289_v52  ;;  %v2230_v60 = vor.u32 %v2712_v54, %v2227_v56  ;;  %v2217_v61 = vld [vmem:[#allocation3 + $0x40] sm:$0xf]  ;;  %v2711_v62 = vld [vmem:[#allocation3 + $0x44] sm:$0xf0] }
  0x14   :  { %v56_v0 = vld [vmem:[%s3327_s0 + $0x60] sm:$0xff]  ;;  %v57_v1 = vld [vmem:[%s3327_s0 + $0x68] sm:$0xff]  ;;  %v2294_v2 = vor.u32 %v2728_v57, %v2291_v58  ;;  %v2218_v7 = vor.u32 %v2711_v62, %v2217_v61  ;;  %v59_v18 = vld [vmem:[%s3327_s0 + $0x78] sm:$0xff] }
  0x15   :  { %468 = vmatpush.bf16.msrb.mxu2 %v2234_v42  ;;  %517 = vmatpush.bf16.msrb.mxu3 %v2298_v43  ;;  %v2281_v3 = vld [vmem:[#allocation3 + $0xc0] sm:$0xf]  ;;  %v2727_v4 = vld [vmem:[#allocation3 + $0xc4] sm:$0xf0]  ;;  %v2710_v5 = vld [vmem:[#allocation3 + $0x44] sm:$0xf]  ;;  %v66_v10 = vpack.c.bf16 %v57_v1, %v56_v0 }
  0x16   :  { %566 = vmatpush.bf16.msrb.mxu0 %v2238_v47  ;;  %615 = vmatpush.bf16.msrb.mxu1 %v2302_v51  ;;  %v2219_v6 = vld [vmem:[#allocation3 + $0x48] sm:$0xf0]  ;;  %v2726_v8 = vld [vmem:[#allocation3 + $0xc4] sm:$0xf]  ;;  %v2282_v11 = vor.u32 %v2727_v4, %v2281_v3  ;;  %v2709_v21 = vld [vmem:[#allocation3 + $0x34] sm:$0xf0] }
  0x17   :  { %v2283_v9 = vld [vmem:[#allocation3 + $0xc8] sm:$0xf0]  ;;  %v2222_v12 = vor.u32 %v2710_v5, %v2219_v6  ;;  %v52_v14 = vld [vmem:[%s3327_s0 + $0x40] sm:$0xff]  ;;  %v2273_v22 = vld [vmem:[#allocation3 + $0xb0] sm:$0xf] }
  0x18   :  { %v2286_v13 = vor.u32 %v2726_v8, %v2283_v9  ;;  %v53_v15 = vld [vmem:[%s3327_s0 + $0x48] sm:$0xff]  ;;  %v2725_v24 = vld [vmem:[#allocation3 + $0xb4] sm:$0xf0]  ;;  %v2708_v25 = vld [vmem:[#allocation3 + $0x34] sm:$0xf] }
  0x19   :  { %469 = vmatpush.bf16.msrb.mxu2 %v2226_v55  ;;  %518 = vmatpush.bf16.msrb.mxu3 %v2290_v59  ;;  %v64_v16 = vpack.c.bf16 %v53_v15, %v52_v14  ;;  %v2211_v26 = vld [vmem:[#allocation3 + $0x38] sm:$0xf0]  ;;  %v2274_v27 = vor.u32 %v2725_v24, %v2273_v22  ;;  %v2724_v29 = vld [vmem:[#allocation3 + $0xb4] sm:$0xf]  ;;  %v2201_v32 = vld [vmem:[#allocation3 + $0x20] sm:$0xf] }
  0x1a   :  { %567 = vmatpush.bf16.msrb.mxu0 %v2230_v60  ;;  %616 = vmatpush.bf16.msrb.mxu1 %v2294_v2  ;;  %v2214_v28 = vor.u32 %v2708_v25, %v2211_v26  ;;  %v2275_v30 = vld [vmem:[#allocation3 + $0xb8] sm:$0xf0]  ;;  %v2707_v33 = vld [vmem:[#allocation3 + $0x24] sm:$0xf0]  ;;  %v2265_v35 = vld [vmem:[#allocation3 + $0xa0] sm:$0xf] }
  0x1b   :  { %v2278_v31 = vor.u32 %v2724_v29, %v2275_v30  ;;  %v2202_v34 = vor.u32 %v2707_v33, %v2201_v32  ;;  %v2723_v36 = vld [vmem:[#allocation3 + $0xa4] sm:$0xf0]  ;;  %v2706_v37 = vld [vmem:[#allocation3 + $0x24] sm:$0xf]  ;;  %v2203_v39 = vld [vmem:[#allocation3 + $0x28] sm:$0xf0] }
  0x1c   :  { %v2266_v38 = vor.u32 %v2723_v36, %v2265_v35  ;;  %v2722_v40 = vld [vmem:[#allocation3 + $0xa4] sm:$0xf]  ;;  %v2267_v41 = vld [vmem:[#allocation3 + $0xa8] sm:$0xf0]  ;;  %v2206_v42 = vor.u32 %v2706_v37, %v2203_v39  ;;  %v2193_v44 = vld [vmem:[#allocation3 + $0x10] sm:$0xf] }
  0x1d   :  { %470 = vmatpush.bf16.msrb.mxu2 %v2218_v7  ;;  %519 = vmatpush.bf16.msrb.mxu3 %v2282_v11  ;;  %v2270_v43 = vor.u32 %v2722_v40, %v2267_v41  ;;  %v2705_v45 = vld [vmem:[#allocation3 + $0x14] sm:$0xf0]  ;;  %v2257_v46 = vld [vmem:[#allocation3 + $0x90] sm:$0xf]  ;;  %v2704_v49 = vld [vmem:[#allocation3 + $0x14] sm:$0xf] }
  0x1e   :  { %568 = vmatpush.bf16.msrb.mxu0 %v2222_v12  ;;  %617 = vmatpush.bf16.msrb.mxu1 %v2286_v13  ;;  %v2194_v47 = vor.u32 %v2705_v45, %v2193_v44  ;;  %v2721_v48 = vld [vmem:[#allocation3 + $0x94] sm:$0xf0]  ;;  %v2195_v50 = vld [vmem:[#allocation3 + $0x18] sm:$0xf0]  ;;  %v2720_v53 = vld [vmem:[#allocation3 + $0x94] sm:$0xf] }
  0x1f   :  { %2168 = vmatmul.msk.bf16.gmra.mxu0 %vm98_vm0, %v61_v17  ;;  %2173 = vmatmul.msk.bf16.gmra.mxu2 %vm98_vm0, %v66_v10  ;;  %v2258_v51 = vor.u32 %v2721_v48, %v2257_v46  ;;  %v2198_v52 = vor.u32 %v2704_v49, %v2195_v50  ;;  %v2259_v54 = vld [vmem:[#allocation3 + $0x98] sm:$0xf0]  ;;  %v2185_v56 = vld [vmem:[#allocation3] sm:$0xf]  ;;  %v2703_v57 = vld [vmem:[#allocation3 + $0x4] sm:$0xf0] }
  0x20   :  { %2176 = vmatmul.msk.bf16.gmra.mxu1 %vm98_vm0, %v61_v17  ;;  %2181 = vmatmul.msk.bf16.gmra.mxu3 %vm98_vm0, %v66_v10  ;;  %v58_v17 = vld [vmem:[%s3327_s0 + $0x70] sm:$0xff]  ;;  %v2262_v55 = vor.u32 %v2720_v53, %v2259_v54  ;;  %v2249_v58 = vld [vmem:[#allocation3 + $0x80] sm:$0xf]  ;;  %v2186_v59 = vor.u32 %v2703_v57, %v2185_v56  ;;  %v2719_v60 = vld [vmem:[#allocation3 + $0x84] sm:$0xf0] }
  0x21   :  { %v67_v19 = vpack.c.bf16 %v59_v18, %v58_v17  ;;  %520 = vmatpush.bf16.msrb.mxu3 %v2274_v27  ;;  %v2702_v61 = vld [vmem:[#allocation3 + $0x4] sm:$0xf]  ;;  %v2187_v62 = vld [vmem:[#allocation3 + $0x8] sm:$0xf0]  ;;  %v72_v4 = vld [vmem:[%s3329_s2] sm:$0x3] }
  0x22   :  { %569 = vmatpush.bf16.msrb.mxu0 %v2214_v28  ;;  %618 = vmatpush.bf16.msrb.mxu1 %v2278_v31  ;;  %v2190_v0 = vor.u32 %v2702_v61, %v2187_v62  ;;  %v2718_v1 = vld [vmem:[#allocation3 + $0x84] sm:$0xf]  ;;  %v2251_v2 = vld [vmem:[#allocation3 + $0x88] sm:$0xf0]  ;;  %v3114_v7 = vperm.slane %v72_v4, 0  ;;  %v3116_v8 = vperm.slane %v72_v4, 1 }
  0x23   :  { %v2254_v3 = vor.u32 %v2718_v1, %v2251_v2 }
  0x25   :  { %521 = vmatpush.bf16.msrb.mxu3 %v2266_v38 }
  0x26   :  { %570 = vmatpush.bf16.msrb.mxu0 %v2206_v42  ;;  %619 = vmatpush.bf16.msrb.mxu1 %v2270_v43 }
  0x29   :  { %522 = vmatpush.bf16.msrb.mxu3 %v2258_v51 }
  0x2a   :  { %571 = vmatpush.bf16.msrb.mxu0 %v2198_v52  ;;  %620 = vmatpush.bf16.msrb.mxu1 %v2262_v55 }
  0x2e   :  { %572 = vmatpush.bf16.msrb.mxu0 %v2190_v0  ;;  %621 = vmatpush.bf16.msrb.mxu1 %v2254_v3 }
  0x2f   :  { %2169 = vmatmul.msk.bf16.gmra.mxu0 %vm98_vm0, %v62_v20  ;;  %2174 = vmatmul.msk.bf16.gmra.mxu2 %vm98_vm0, %v67_v19 }
  0x30   :  { %2177 = vmatmul.msk.bf16.gmra.mxu1 %vm98_vm0, %v62_v20  ;;  %2182 = vmatmul.msk.bf16.gmra.mxu3 %vm98_vm0, %v67_v19  ;;  %v2209_v20 = vld [vmem:[#allocation3 + $0x30] sm:$0xf] }
  0x31   :  { %v2210_v23 = vor.u32 %v2709_v21, %v2209_v20 }
  0x33   :  { %471 = vmatpush.bf16.msrb.mxu2 %v2210_v23 }
  0x37   :  { %472 = vmatpush.bf16.msrb.mxu2 %v2202_v34 }
  0x3b   :  { %473 = vmatpush.bf16.msrb.mxu2 %v2194_v47 }
  0x3f   :  { %2170 = vmatmul.msk.bf16.gmra.mxu0 %vm98_vm0, %v63_v63  ;;  %474 = vmatpush.bf16.msrb.mxu2 %v2186_v59 }
  0x40   :  { %2178 = vmatmul.msk.bf16.gmra.mxu1 %vm98_vm0, %v63_v63  ;;  %v2250_v63 = vor.u32 %v2719_v60, %v2249_v58 }
  0x42   :  { %523 = vmatpush.bf16.msrb.mxu3 %v2250_v63 }
  0x4f   :  { %2171 = vmatmul.msk.bf16.gmra.mxu0 %vm98_vm0, %v64_v16 }
  0x50   :  { %2179 = vmatmul.msk.bf16.gmra.mxu1 %vm98_vm0, %v64_v16 }
  0x8c   :  { %v132_v5 = vpop.f32.mrf.mxu0 }
  0x8d   :  { %v181_v6 = vpop.f32.mrf.mxu1  ;;  %v133_v9 = vadd.f32 %v132_v5, %v3114_v7 }
  0x8e   :  { %v182_v10 = vadd.f32 %v181_v6, %v3116_v8 }
  0x8f   :  { %v221_v15 = vmax.f32 %v133_v9, 0.0 }
  0x90   :  { %v222_v17 = vmax.f32 %v182_v10, 0.0 }
  0x92   :  { %v157_v63 = vpop.f32.mrf.mxu2 }
  0x93   :  { %v206_v1 = vpop.f32.mrf.mxu3 }
  0x94   :  { %v134_v11 = vpop.f32.mrf.mxu0 }
  0x95   :  { %v135_v12 = vadd.f32 %v134_v11, %v3114_v7  ;;  %v183_v13 = vpop.f32.mrf.mxu1 }
  0x96   :  { %v184_v14 = vadd.f32 %v183_v13, %v3116_v8 }
  0x97   :  { %v223_v16 = vmax.f32 %v135_v12, 0.0 }
  0x98   :  { %v224_v18 = vmax.f32 %v184_v14, 0.0 }
  0x99   :  { %v253_v19 = vpack.c.bf16 %v223_v16, %v221_v15 }
  0x9a   :  { %v254_v20 = vpack.c.bf16 %v224_v18, %v222_v17  ;;  %v159_v11 = vpop.f32.mrf.mxu2 }
  0x9b   :  { %475 = vmatmul.bf16.vlgmr.msrb.gmra.mxu2 %v253_v19  ;;  %573 = vmatmul.bf16.vlgmr.msrb.gmra.mxu0 %v253_v19  ;;  %v208_v12 = vpop.f32.mrf.mxu3  ;;  %v2434_v19 = vld [vmem:[#allocation3 + $0x1f0] sm:$0xf] }
  0x9c   :  { %524 = vmatmul.bf16.vlgmr.msrb.gmra.mxu3 %v254_v20  ;;  %622 = vmatmul.bf16.vlgmr.msrb.gmra.mxu1 %v254_v20  ;;  %v137_v21 = vpop.f32.mrf.mxu0  ;;  %v2765_v20 = vld [vmem:[#allocation3 + $0x1f4] sm:$0xf0] }
  0x9d   :  { %v186_v22 = vpop.f32.mrf.mxu1  ;;  %v138_v23 = vadd.f32 %v137_v21, %v3114_v7  ;;  %v2764_v21 = vld [vmem:[#allocation3 + $0x1f4] sm:$0xf] }
  0x9e   :  { %v187_v24 = vadd.f32 %v186_v22, %v3116_v8  ;;  %v2435_v22 = vor.u32 %v2765_v20, %v2434_v19  ;;  %v2744_v19 = vld [vmem:[#allocation3 + $0x154] sm:$0xf] }
  0x9f   :  { %v225_v29 = vmax.f32 %v138_v23, 0.0  ;;  %v2436_v23 = vld [vmem:[#allocation3 + $0x1f8] sm:$0xf0] }
  0xa0   :  { %v226_v31 = vmax.f32 %v187_v24, 0.0  ;;  %v2439_v24 = vor.u32 %v2764_v21, %v2436_v23  ;;  %960 = vmatpush.bf16.msra.mxu3 %v2435_v22  ;;  %v2356_v21 = vld [vmem:[#allocation3 + $0x158] sm:$0xf0]  ;;  %v2402_v23 = vld [vmem:[#allocation3 + $0x1b0] sm:$0xf] }
  0xa1   :  { %v2359_v22 = vor.u32 %v2744_v19, %v2356_v21  ;;  %v2314_v21 = vld [vmem:[#allocation3 + $0x100] sm:$0xf] }
  0xa2   :  { %1058 = vmatpush.bf16.msra.mxu1 %v2439_v24  ;;  %v2757_v24 = vld [vmem:[#allocation3 + $0x1b4] sm:$0xf0] }
  0xa4   :  { %v139_v25 = vpop.f32.mrf.mxu0 }
  0xa5   :  { %v140_v26 = vadd.f32 %v139_v25, %v3114_v7  ;;  %v188_v27 = vpop.f32.mrf.mxu1  ;;  %v162_v25 = vpop.f32.mrf.mxu2 }
  0xa6   :  { %v189_v28 = vadd.f32 %v188_v27, %v3116_v8  ;;  %v158_v27 = vadd.f32 %v157_v63, %v3114_v7 }
  0xa7   :  { %v227_v30 = vmax.f32 %v140_v26, 0.0  ;;  %v211_v26 = vpop.f32.mrf.mxu3 }
  0xa8   :  { %v228_v32 = vmax.f32 %v189_v28, 0.0  ;;  %v160_v28 = vadd.f32 %v159_v11, %v3114_v7 }
  0xa9   :  { %v255_v33 = vpack.c.bf16 %v227_v30, %v225_v29  ;;  %v207_v29 = vadd.f32 %v206_v1, %v3116_v8  ;;  %v209_v30 = vadd.f32 %v208_v12, %v3116_v8  ;;  %v2364_v1 = vld [vmem:[#allocation3 + $0x168] sm:$0xf0] }
  0xaa   :  { %v256_v34 = vpack.c.bf16 %v228_v32, %v226_v31  ;;  %v241_v31 = vmax.f32 %v158_v27, 0.0  ;;  %v243_v32 = vmax.f32 %v160_v28, 0.0  ;;  %v2403_v27 = vor.u32 %v2757_v24, %v2402_v23  ;;  %v2404_v28 = vld [vmem:[#allocation3 + $0x1b8] sm:$0xf0]  ;;  %v2734_v23 = vld [vmem:[#allocation3 + $0x104] sm:$0xf] }
  0xab   :  { %480 = vmatmul.bf16.gmra.mxu2 %v255_v33  ;;  %578 = vmatmul.bf16.gmra.mxu0 %v255_v33  ;;  %v242_v33 = vmax.f32 %v207_v29, 0.0 }
  0xac   :  { %529 = vmatmul.bf16.gmra.mxu3 %v256_v34  ;;  %627 = vmatmul.bf16.gmra.mxu1 %v256_v34  ;;  %v142_v35 = vpop.f32.mrf.mxu0  ;;  %v244_v34 = vmax.f32 %v209_v30, 0.0 }
  0xad   :  { %v191_v36 = vpop.f32.mrf.mxu1  ;;  %v143_v37 = vadd.f32 %v142_v35, %v3114_v7  ;;  %v263_v35 = vpack.c.bf16 %v243_v32, %v241_v31  ;;  %v2346_v31 = vld [vmem:[#allocation3 + $0x140] sm:$0xf]  ;;  %v2743_v32 = vld [vmem:[#allocation3 + $0x144] sm:$0xf0] }
  0xae   :  { %v192_v38 = vadd.f32 %v191_v36, %v3116_v8  ;;  %v264_v36 = vpack.c.bf16 %v244_v34, %v242_v33  ;;  %v2742_v33 = vld [vmem:[#allocation3 + $0x144] sm:$0xf]  ;;  %v2347_v34 = vor.u32 %v2743_v32, %v2346_v31 }
  0xaf   :  { %v229_v43 = vmax.f32 %v143_v37, 0.0  ;;  %v164_v37 = vpop.f32.mrf.mxu2 }
  0xb0   :  { %v230_v45 = vmax.f32 %v192_v38, 0.0  ;;  %v213_v38 = vpop.f32.mrf.mxu3 }
  0xb1   :  { %v214_v63 = vadd.f32 %v213_v38, %v3116_v8  ;;  %v2755_v38 = vld [vmem:[#allocation3 + $0x1a4] sm:$0xf0] }
  0xb4   :  { %v144_v39 = vpop.f32.mrf.mxu0 }
  0xb5   :  { %v145_v40 = vadd.f32 %v144_v39, %v3114_v7  ;;  %v193_v41 = vpop.f32.mrf.mxu1  ;;  %v2426_v39 = vld [vmem:[#allocation3 + $0x1e0] sm:$0xf] }
  0xb6   :  { %v194_v42 = vadd.f32 %v193_v41, %v3116_v8  ;;  %v2762_v41 = vld [vmem:[#allocation3 + $0x1e4] sm:$0xf] }
  0xb7   :  { %v231_v44 = vmax.f32 %v145_v40, 0.0  ;;  %v2763_v40 = vld [vmem:[#allocation3 + $0x1e4] sm:$0xf0] }
  0xb8   :  { %v232_v46 = vmax.f32 %v194_v42, 0.0  ;;  %v2427_v42 = vor.u32 %v2763_v40, %v2426_v39  ;;  %v216_v11 = vpop.f32.mrf.mxu3  ;;  %v2754_v39 = vld [vmem:[#allocation3 + $0x1a4] sm:$0xf] }
  0xb9   :  { %v257_v47 = vpack.c.bf16 %v231_v44, %v229_v43  ;;  %v2428_v43 = vld [vmem:[#allocation3 + $0x1e8] sm:$0xf0]  ;;  %v2370_v44 = vld [vmem:[#allocation3 + $0x170] sm:$0xf] }
  0xba   :  { %v258_v48 = vpack.c.bf16 %v232_v46, %v230_v45  ;;  %v2749_v45 = vld [vmem:[#allocation3 + $0x174] sm:$0xf0]  ;;  %v2431_v46 = vor.u32 %v2762_v41, %v2428_v43  ;;  %961 = vmatpush.bf16.msra.mxu3 %v2427_v42  ;;  %v2396_v41 = vld [vmem:[#allocation3 + $0x1a8] sm:$0xf0] }
  0xbb   :  { %485 = vmatmul.bf16.gmra.mxu2 %v257_v47  ;;  %583 = vmatmul.bf16.gmra.mxu0 %v257_v47  ;;  %v2371_v47 = vor.u32 %v2749_v45, %v2370_v44  ;;  %v2399_v44 = vor.u32 %v2754_v39, %v2396_v41  ;;  %v2338_v45 = vld [vmem:[#allocation3 + $0x130] sm:$0xf] }
  0xbc   :  { %534 = vmatmul.bf16.gmra.mxu3 %v258_v48  ;;  %632 = vmatmul.bf16.gmra.mxu1 %v258_v48  ;;  %v147_v49 = vpop.f32.mrf.mxu0  ;;  %v2748_v48 = vld [vmem:[#allocation3 + $0x174] sm:$0xf] }
  0xbd   :  { %v196_v50 = vpop.f32.mrf.mxu1  ;;  %v148_v51 = vadd.f32 %v147_v49, %v3114_v7  ;;  %v2372_v49 = vld [vmem:[#allocation3 + $0x178] sm:$0xf0]  ;;  %1059 = vmatpush.bf16.msra.mxu1 %v2431_v46  ;;  %911 = vmatpush.bf16.msra.mxu2 %v2371_v47  ;;  %v2741_v46 = vld [vmem:[#allocation3 + $0x134] sm:$0xf0]  ;;  %v2740_v47 = vld [vmem:[#allocation3 + $0x134] sm:$0xf] }
  0xbe   :  { %v197_v52 = vadd.f32 %v196_v50, %v3116_v8  ;;  %v2418_v50 = vld [vmem:[#allocation3 + $0x1d0] sm:$0xf] }
  0xbf   :  { %v233_v57 = vmax.f32 %v148_v51, 0.0  ;;  %v2375_v51 = vor.u32 %v2748_v48, %v2372_v49  ;;  %v2339_v49 = vor.u32 %v2741_v46, %v2338_v45 }
  0xc0   :  { %v234_v59 = vmax.f32 %v197_v52, 0.0  ;;  %v2761_v52 = vld [vmem:[#allocation3 + $0x1d4] sm:$0xf0]  ;;  %v218_v43 = vpop.f32.mrf.mxu3 }
  0xc1   :  { %1009 = vmatpush.bf16.msra.mxu0 %v2375_v51  ;;  %v217_v51 = vadd.f32 %v216_v11, %v3116_v8  ;;  %v2380_v11 = vld [vmem:[#allocation3 + $0x188] sm:$0xf0] }
  0xc4   :  { %v149_v53 = vpop.f32.mrf.mxu0 }
  0xc5   :  { %v150_v54 = vadd.f32 %v149_v53, %v3114_v7  ;;  %v198_v55 = vpop.f32.mrf.mxu1  ;;  %v2760_v53 = vld [vmem:[#allocation3 + $0x1d4] sm:$0xf] }
  0xc6   :  { %v199_v56 = vadd.f32 %v198_v55, %v3116_v8  ;;  %v163_v55 = vadd.f32 %v162_v25, %v3114_v7  ;;  %v2756_v25 = vld [vmem:[#allocation3 + $0x1b4] sm:$0xf] }
  0xc7   :  { %v235_v58 = vmax.f32 %v150_v54, 0.0  ;;  %v2420_v54 = vld [vmem:[#allocation3 + $0x1d8] sm:$0xf0]  ;;  %v2407_v30 = vor.u32 %v2756_v25, %v2404_v28  ;;  %v2316_v25 = vld [vmem:[#allocation3 + $0x108] sm:$0xf0] }
  0xc8   :  { %v236_v60 = vmax.f32 %v199_v56, 0.0  ;;  %v2419_v56 = vor.u32 %v2761_v52, %v2418_v50  ;;  %v2340_v50 = vld [vmem:[#allocation3 + $0x138] sm:$0xf0] }
  0xc9   :  { %v259_v61 = vpack.c.bf16 %v235_v58, %v233_v57  ;;  %v2423_v57 = vor.u32 %v2760_v53, %v2420_v54  ;;  %v2362_v58 = vld [vmem:[#allocation3 + $0x160] sm:$0xf]  ;;  %v2343_v52 = vor.u32 %v2740_v47, %v2340_v50  ;;  %v2386_v53 = vld [vmem:[#allocation3 + $0x190] sm:$0xf]  ;;  %v2753_v54 = vld [vmem:[#allocation3 + $0x194] sm:$0xf0] }
  0xca   :  { %v260_v62 = vpack.c.bf16 %v236_v60, %v234_v59  ;;  %v2747_v59 = vld [vmem:[#allocation3 + $0x164] sm:$0xf0]  ;;  %v2746_v60 = vld [vmem:[#allocation3 + $0x164] sm:$0xf]  ;;  %962 = vmatpush.bf16.msra.mxu3 %v2419_v56 }
  0xcb   :  { %490 = vmatmul.bf16.gmra.mxu2 %v259_v61  ;;  %588 = vmatmul.bf16.gmra.mxu0 %v259_v61  ;;  %v212_v61 = vadd.f32 %v211_v26, %v3116_v8 }
  0xcc   :  { %539 = vmatmul.bf16.gmra.mxu3 %v260_v62  ;;  %637 = vmatmul.bf16.gmra.mxu1 %v260_v62  ;;  %v152_v0 = vpop.f32.mrf.mxu0  ;;  %v165_v62 = vadd.f32 %v164_v37, %v3114_v7  ;;  %v2394_v37 = vld [vmem:[#allocation3 + $0x1a0] sm:$0xf] }
  0xcd   :  { %v201_v2 = vpop.f32.mrf.mxu1  ;;  %v153_v3 = vadd.f32 %v152_v0, %v3114_v7  ;;  %v2363_v0 = vor.u32 %v2747_v59, %v2362_v58  ;;  %1060 = vmatpush.bf16.msra.mxu1 %v2423_v57  ;;  %v2395_v40 = vor.u32 %v2755_v38, %v2394_v37  ;;  %v219_v57 = vadd.f32 %v218_v43, %v3116_v8  ;;  %v2388_v59 = vld [vmem:[#allocation3 + $0x198] sm:$0xf0] }
  0xce   :  { %v202_v4 = vadd.f32 %v201_v2, %v3116_v8  ;;  %v2410_v2 = vld [vmem:[#allocation3 + $0x1c0] sm:$0xf]  ;;  %v2387_v58 = vor.u32 %v2753_v54, %v2386_v53 }
  0xcf   :  { %v237_v13 = vmax.f32 %v153_v3, 0.0  ;;  %v2759_v3 = vld [vmem:[#allocation3 + $0x1c4] sm:$0xf0]  ;;  %912 = vmatpush.bf16.msra.mxu2 %v2363_v0 }
  0xd0   :  { %v238_v15 = vmax.f32 %v202_v4, 0.0  ;;  %v2367_v4 = vor.u32 %v2746_v60, %v2364_v1 }
  0xd2   :  { %1010 = vmatpush.bf16.msra.mxu0 %v2367_v4  ;;  %v2378_v4 = vld [vmem:[#allocation3 + $0x180] sm:$0xf] }
  0xd4   :  { %v154_v5 = vpop.f32.mrf.mxu0 }
  0xd5   :  { %v155_v6 = vadd.f32 %v154_v5, %v3114_v7  ;;  %v203_v9 = vpop.f32.mrf.mxu1  ;;  %v2758_v5 = vld [vmem:[#allocation3 + $0x1c4] sm:$0xf] }
  0xd6   :  { %v204_v10 = vadd.f32 %v203_v9, %v3116_v8  ;;  %v2411_v9 = vor.u32 %v2759_v3, %v2410_v2  ;;  %1011 = vmatpush.bf16.msra.mxu0 %v2359_v22  ;;  %v2332_v2 = vld [vmem:[#allocation3 + $0x128] sm:$0xf0]  ;;  %v252_v8 = vmax.f32 %v219_v57, 0.0  ;;  %v2735_v22 = vld [vmem:[#allocation3 + $0x104] sm:$0xf0] }
  0xd7   :  { %v239_v14 = vmax.f32 %v155_v6, 0.0  ;;  %v2412_v6 = vld [vmem:[#allocation3 + $0x1c8] sm:$0xf0]  ;;  %v2315_v24 = vor.u32 %v2735_v22, %v2314_v21 }
  0xd8   :  { %v240_v16 = vmax.f32 %v204_v10, 0.0  ;;  %v167_v10 = vpop.f32.mrf.mxu2  ;;  %v2415_v12 = vor.u32 %v2758_v5, %v2412_v6  ;;  %963 = vmatpush.bf16.msra.mxu3 %v2411_v9  ;;  %v2751_v5 = vld [vmem:[#allocation3 + $0x184] sm:$0xf0]  ;;  %v2750_v6 = vld [vmem:[#allocation3 + $0x184] sm:$0xf] }
  0xd9   :  { %v261_v17 = vpack.c.bf16 %v239_v14, %v237_v13  ;;  %v245_v13 = vmax.f32 %v163_v55, 0.0  ;;  %v246_v14 = vmax.f32 %v212_v61, 0.0  ;;  %v168_v48 = vadd.f32 %v167_v10, %v3114_v7  ;;  %v2752_v55 = vld [vmem:[#allocation3 + $0x194] sm:$0xf]  ;;  %v2330_v61 = vld [vmem:[#allocation3 + $0x120] sm:$0xf] }
  0xda   :  { %v262_v18 = vpack.c.bf16 %v240_v16, %v238_v15  ;;  %v247_v15 = vmax.f32 %v165_v62, 0.0  ;;  %v248_v16 = vmax.f32 %v214_v63, 0.0  ;;  %1061 = vmatpush.bf16.msra.mxu1 %v2415_v12  ;;  %v2391_v60 = vor.u32 %v2752_v55, %v2388_v59  ;;  %v2739_v62 = vld [vmem:[#allocation3 + $0x124] sm:$0xf0]  ;;  %v2738_v63 = vld [vmem:[#allocation3 + $0x124] sm:$0xf] }
  0xdb   :  { %495 = vmatmul.bf16.gmra.mxu2 %v261_v17  ;;  %593 = vmatmul.bf16.gmra.mxu0 %v261_v17  ;;  %v2354_v17 = vld [vmem:[#allocation3 + $0x150] sm:$0xf]  ;;  %v249_v0 = vmax.f32 %v168_v48, 0.0  ;;  %v2331_v1 = vor.u32 %v2739_v62, %v2330_v61  ;;  %v2335_v3 = vor.u32 %v2738_v63, %v2332_v2  ;;  %v2379_v10 = vor.u32 %v2751_v5, %v2378_v4 }
  0xdc   :  { %544 = vmatmul.bf16.gmra.mxu3 %v262_v18  ;;  %642 = vmatmul.bf16.gmra.mxu1 %v262_v18  ;;  %v2745_v18 = vld [vmem:[#allocation3 + $0x154] sm:$0xf0]  ;;  %v265_v26 = vpack.c.bf16 %v247_v15, %v245_v13  ;;  %v266_v29 = vpack.c.bf16 %v248_v16, %v246_v14  ;;  %v2383_v12 = vor.u32 %v2750_v6, %v2380_v11  ;;  %v2322_v13 = vld [vmem:[#allocation3 + $0x110] sm:$0xf]  ;;  %v2736_v15 = vld [vmem:[#allocation3 + $0x114] sm:$0xf] }
  0xdd   :  { %v2355_v20 = vor.u32 %v2745_v18, %v2354_v17  ;;  %964 = vmatpush.bf16.msra.mxu3 %v2403_v27  ;;  %v2737_v14 = vld [vmem:[#allocation3 + $0x114] sm:$0xf0]  ;;  %v2324_v17 = vld [vmem:[#allocation3 + $0x118] sm:$0xf0]  ;;  %v301_v27 = vld [vmem:[%s3331_s4] sm:$0x3] }
  0xde   :  { %1062 = vmatpush.bf16.msra.mxu1 %v2407_v30  ;;  %v2323_v16 = vor.u32 %v2737_v14, %v2322_v13  ;;  %v2327_v18 = vor.u32 %v2736_v15, %v2324_v17 }
  0xdf   :  { %913 = vmatpush.bf16.msra.mxu2 %v2355_v20 }
  0xe0   :  { %v169_v42 = vpop.f32.mrf.mxu2 }
  0xe1   :  { %v170_v56 = vadd.f32 %v169_v42, %v3114_v7  ;;  %965 = vmatpush.bf16.msra.mxu3 %v2395_v40  ;;  %v250_v7 = vmax.f32 %v217_v51, 0.0 }
  0xe2   :  { %1063 = vmatpush.bf16.msra.mxu1 %v2399_v44 }
  0xe3   :  { %914 = vmatpush.bf16.msra.mxu2 %v2347_v34  ;;  %v251_v9 = vmax.f32 %v170_v56, 0.0  ;;  %v268_v20 = vpack.c.bf16 %v252_v8, %v250_v7 }
  0xe5   :  { %966 = vmatpush.bf16.msra.mxu3 %v2387_v58  ;;  %v267_v19 = vpack.c.bf16 %v251_v9, %v249_v0 }
  0xe6   :  { %1064 = vmatpush.bf16.msra.mxu1 %v2391_v60 }
  0xe7   :  { %915 = vmatpush.bf16.msra.mxu2 %v2339_v49 }
  0xe9   :  { %967 = vmatpush.bf16.msra.mxu3 %v2379_v10 }
  0xea   :  { %1065 = vmatpush.bf16.msra.mxu1 %v2383_v12 }
  0xeb   :  { %500 = vmatmul.bf16.gmra.mxu2 %v263_v35  ;;  %598 = vmatmul.bf16.gmra.mxu0 %v263_v35  ;;  %v2348_v35 = vld [vmem:[#allocation3 + $0x148] sm:$0xf0] }
  0xec   :  { %549 = vmatmul.bf16.gmra.mxu3 %v264_v36  ;;  %647 = vmatmul.bf16.gmra.mxu1 %v264_v36  ;;  %v2351_v36 = vor.u32 %v2742_v33, %v2348_v35  ;;  %v3156_v33 = vperm.slane %v301_v27, 0 }
  0xed   :  { %916 = vmatpush.bf16.msra.mxu2 %v2331_v1 }
  0xee   :  { %1012 = vmatpush.bf16.msra.mxu0 %v2351_v36 }
  0xf1   :  { %917 = vmatpush.bf16.msra.mxu2 %v2323_v16 }
  0xf2   :  { %1013 = vmatpush.bf16.msra.mxu0 %v2343_v52 }
  0xf5   :  { %918 = vmatpush.bf16.msra.mxu2 %v2315_v24 }
  0xf6   :  { %1014 = vmatpush.bf16.msra.mxu0 %v2335_v3 }
  0xfa   :  { %1015 = vmatpush.bf16.msra.mxu0 %v2327_v18 }
  0xfb   :  { %505 = vmatmul.bf16.gmra.mxu2 %v265_v26  ;;  %603 = vmatmul.bf16.gmra.mxu0 %v265_v26  ;;  %v2319_v26 = vor.u32 %v2734_v23, %v2316_v25 }
  0xfc   :  { %554 = vmatmul.bf16.gmra.mxu3 %v266_v29  ;;  %652 = vmatmul.bf16.gmra.mxu1 %v266_v29  ;;  %v3153_v29 = vperm.slane %v301_v27, 1 }
  0xfe   :  { %1016 = vmatpush.bf16.msra.mxu0 %v2319_v26 }
 0x10b   :  { %510 = vmatmul.bf16.gmra.mxu2 %v267_v19  ;;  %608 = vmatmul.bf16.gmra.mxu0 %v267_v19 }
 0x10c   :  { %559 = vmatmul.bf16.gmra.mxu3 %v268_v20  ;;  %657 = vmatmul.bf16.gmra.mxu1 %v268_v20 }
 0x118   :  { %v574_v28 = vpop.f32.mrf.mxu0 }
 0x119   :  { %v623_v30 = vpop.f32.mrf.mxu1  ;;  %v575_v31 = vadd.f32 %v574_v28, %v3153_v29 }
 0x11b   :  { %v624_v36 = vadd.f32 %v623_v30, %v575_v31 }
 0x11d   :  { %v664_v41 = vmax.f32 %v624_v36, 0.0 }
 0x11e   :  { %v476_v32 = vpop.f32.mrf.mxu2 }
 0x11f   :  { %v525_v34 = vpop.f32.mrf.mxu3  ;;  %v477_v39 = vadd.f32 %v476_v32, %v3156_v33 }
 0x120   :  { %v576_v35 = vpop.f32.mrf.mxu0 }
 0x121   :  { %v577_v37 = vadd.f32 %v576_v35, %v3153_v29  ;;  %v625_v38 = vpop.f32.mrf.mxu1  ;;  %v526_v44 = vadd.f32 %v525_v34, %v477_v39 }
 0x123   :  { %v626_v40 = vadd.f32 %v625_v38, %v577_v37  ;;  %v663_v51 = vmax.f32 %v526_v44, 0.0 }
 0x125   :  { %v666_v42 = vmax.f32 %v626_v40, 0.0 }
 0x126   :  { %v478_v43 = vpop.f32.mrf.mxu2 }
 0x127   :  { %v696_v45 = vpack.c.bf16 %v666_v42, %v664_v41  ;;  %v479_v46 = vadd.f32 %v478_v43, %v3156_v33  ;;  %v527_v47 = vpop.f32.mrf.mxu3 }
 0x128   :  { %v579_v48 = vpop.f32.mrf.mxu0 }
 0x129   :  { %v528_v49 = vadd.f32 %v527_v47, %v479_v46  ;;  %v628_v50 = vpop.f32.mrf.mxu1  ;;  %968 = vmatmul.bf16.vlgmr.msra.gmra.mxu3 %v696_v45  ;;  %1066 = vmatmul.bf16.vlgmr.msra.gmra.mxu1 %v696_v45  ;;  %v580_v54 = vadd.f32 %v579_v48, %v3153_v29 }
 0x12b   :  { %v665_v52 = vmax.f32 %v528_v49, 0.0  ;;  %v629_v58 = vadd.f32 %v628_v50, %v580_v54 }
 0x12d   :  { %v695_v53 = vpack.c.bf16 %v665_v52, %v663_v51  ;;  %v668_v63 = vmax.f32 %v629_v58, 0.0 }
 0x12e   :  { %v481_v55 = vpop.f32.mrf.mxu2 }
 0x12f   :  { %v530_v56 = vpop.f32.mrf.mxu3  ;;  %919 = vmatmul.bf16.vlgmr.msra.gmra.mxu2 %v695_v53  ;;  %1017 = vmatmul.bf16.vlgmr.msra.gmra.mxu0 %v695_v53  ;;  %v482_v61 = vadd.f32 %v481_v55, %v3156_v33 }
 0x130   :  { %v581_v57 = vpop.f32.mrf.mxu0 }
 0x131   :  { %v582_v59 = vadd.f32 %v581_v57, %v3153_v29  ;;  %v630_v60 = vpop.f32.mrf.mxu1  ;;  %v531_v2 = vadd.f32 %v530_v56, %v482_v61 }
 0x133   :  { %v631_v62 = vadd.f32 %v630_v60, %v582_v59  ;;  %v667_v8 = vmax.f32 %v531_v2, 0.0 }
 0x135   :  { %v670_v0 = vmax.f32 %v631_v62, 0.0 }
 0x136   :  { %v483_v1 = vpop.f32.mrf.mxu2 }
 0x137   :  { %v484_v3 = vadd.f32 %v483_v1, %v3156_v33  ;;  %v532_v4 = vpop.f32.mrf.mxu3  ;;  %v698_v5 = vpack.c.bf16 %v670_v0, %v668_v63 }
 0x138   :  { %v584_v6 = vpop.f32.mrf.mxu0 }
 0x139   :  { %v533_v7 = vadd.f32 %v532_v4, %v484_v3  ;;  %v633_v9 = vpop.f32.mrf.mxu1  ;;  %973 = vmatmul.bf16.gmra.mxu3 %v698_v5  ;;  %1071 = vmatmul.bf16.gmra.mxu1 %v698_v5  ;;  %v585_v11 = vadd.f32 %v584_v6, %v3153_v29 }
 0x13b   :  { %v669_v10 = vmax.f32 %v533_v7, 0.0  ;;  %v634_v16 = vadd.f32 %v633_v9, %v585_v11 }
 0x13d   :  { %v697_v12 = vpack.c.bf16 %v669_v10, %v667_v8  ;;  %v672_v21 = vmax.f32 %v634_v16, 0.0 }
 0x13e   :  { %v486_v13 = vpop.f32.mrf.mxu2 }
 0x13f   :  { %v535_v14 = vpop.f32.mrf.mxu3  ;;  %924 = vmatmul.bf16.gmra.mxu2 %v697_v12  ;;  %1022 = vmatmul.bf16.gmra.mxu0 %v697_v12  ;;  %v487_v19 = vadd.f32 %v486_v13, %v3156_v33 }
 0x140   :  { %v586_v15 = vpop.f32.mrf.mxu0 }
 0x141   :  { %v587_v17 = vadd.f32 %v586_v15, %v3153_v29  ;;  %v635_v18 = vpop.f32.mrf.mxu1  ;;  %v536_v24 = vadd.f32 %v535_v14, %v487_v19 }
 0x143   :  { %v636_v20 = vadd.f32 %v635_v18, %v587_v17  ;;  %v671_v32 = vmax.f32 %v536_v24, 0.0 }
 0x145   :  { %v674_v22 = vmax.f32 %v636_v20, 0.0 }
 0x146   :  { %v488_v23 = vpop.f32.mrf.mxu2 }
 0x147   :  { %v489_v25 = vadd.f32 %v488_v23, %v3156_v33  ;;  %v537_v26 = vpop.f32.mrf.mxu3  ;;  %v700_v27 = vpack.c.bf16 %v674_v22, %v672_v21 }
 0x148   :  { %v589_v28 = vpop.f32.mrf.mxu0 }
 0x149   :  { %v538_v30 = vadd.f32 %v537_v26, %v489_v25  ;;  %v638_v31 = vpop.f32.mrf.mxu1  ;;  %978 = vmatmul.bf16.gmra.mxu3 %v700_v27  ;;  %1076 = vmatmul.bf16.gmra.mxu1 %v700_v27  ;;  %v590_v35 = vadd.f32 %v589_v28, %v3153_v29 }
 0x14b   :  { %v673_v34 = vmax.f32 %v538_v30, 0.0  ;;  %v639_v40 = vadd.f32 %v638_v31, %v590_v35 }
 0x14d   :  { %v699_v36 = vpack.c.bf16 %v673_v34, %v671_v32  ;;  %v676_v45 = vmax.f32 %v639_v40, 0.0  ;;  %v2797_v40 = vld [vmem:[#allocation3 + $0x2f4] sm:$0xf0] }
 0x14e   :  { %v491_v37 = vpop.f32.mrf.mxu2 }
 0x14f   :  { %v540_v38 = vpop.f32.mrf.mxu3  ;;  %929 = vmatmul.bf16.gmra.mxu2 %v699_v36  ;;  %1027 = vmatmul.bf16.gmra.mxu0 %v699_v36  ;;  %v492_v43 = vadd.f32 %v491_v37, %v3156_v33 }
 0x150   :  { %v591_v39 = vpop.f32.mrf.mxu0 }
 0x151   :  { %v592_v41 = vadd.f32 %v591_v39, %v3153_v29  ;;  %v640_v42 = vpop.f32.mrf.mxu1  ;;  %v541_v48 = vadd.f32 %v540_v38, %v492_v43  ;;  %v2563_v39 = vld [vmem:[#allocation3 + $0x2f0] sm:$0xf]  ;;  %v2565_v43 = vld [vmem:[#allocation3 + $0x2f8] sm:$0xf0] }
 0x153   :  { %v641_v44 = vadd.f32 %v640_v42, %v592_v41  ;;  %v675_v55 = vmax.f32 %v541_v48, 0.0  ;;  %v2564_v41 = vor.u32 %v2797_v40, %v2563_v39  ;;  %v2796_v42 = vld [vmem:[#allocation3 + $0x2f4] sm:$0xf]  ;;  %v2485_v39 = vld [vmem:[#allocation3 + $0x258] sm:$0xf0] }
 0x155   :  { %v678_v46 = vmax.f32 %v641_v44, 0.0  ;;  %1404 = vmatpush.bf16.msrb.mxu3 %v2564_v41  ;;  %v2531_v41 = vld [vmem:[#allocation3 + $0x2b0] sm:$0xf] }
 0x156   :  { %v493_v47 = vpop.f32.mrf.mxu2 }
 0x157   :  { %v494_v49 = vadd.f32 %v493_v47, %v3156_v33  ;;  %v542_v50 = vpop.f32.mrf.mxu3  ;;  %v702_v51 = vpack.c.bf16 %v678_v46, %v676_v45  ;;  %v2568_v46 = vor.u32 %v2796_v42, %v2565_v43  ;;  %v2789_v42 = vld [vmem:[#allocation3 + $0x2b4] sm:$0xf0] }
 0x158   :  { %v594_v52 = vpop.f32.mrf.mxu0 }
 0x159   :  { %v543_v53 = vadd.f32 %v542_v50, %v494_v49  ;;  %v643_v54 = vpop.f32.mrf.mxu1  ;;  %983 = vmatmul.bf16.gmra.mxu3 %v702_v51  ;;  %1081 = vmatmul.bf16.gmra.mxu1 %v702_v51  ;;  %v595_v57 = vadd.f32 %v594_v52, %v3153_v29  ;;  %v2555_v49 = vld [vmem:[#allocation3 + $0x2e0] sm:$0xf]  ;;  %v2795_v50 = vld [vmem:[#allocation3 + $0x2e4] sm:$0xf0]  ;;  %v2794_v51 = vld [vmem:[#allocation3 + $0x2e4] sm:$0xf] }
 0x15a   :  { %1502 = vmatpush.bf16.msrb.mxu1 %v2568_v46  ;;  %v2788_v46 = vld [vmem:[#allocation3 + $0x2b4] sm:$0xf] }
 0x15b   :  { %v677_v56 = vmax.f32 %v543_v53, 0.0  ;;  %v644_v62 = vadd.f32 %v643_v54, %v595_v57  ;;  %v2556_v53 = vor.u32 %v2795_v50, %v2555_v49  ;;  %v2557_v54 = vld [vmem:[#allocation3 + $0x2e8] sm:$0xf0]  ;;  %v2475_v50 = vld [vmem:[#allocation3 + $0x240] sm:$0xf] }
 0x15d   :  { %v701_v58 = vpack.c.bf16 %v677_v56, %v675_v55  ;;  %v680_v3 = vmax.f32 %v644_v62, 0.0  ;;  %v2499_v55 = vld [vmem:[#allocation3 + $0x270] sm:$0xf]  ;;  %v2781_v56 = vld [vmem:[#allocation3 + $0x274] sm:$0xf0]  ;;  %1405 = vmatpush.bf16.msrb.mxu3 %v2556_v53 }
 0x15e   :  { %v496_v59 = vpop.f32.mrf.mxu2  ;;  %v2780_v62 = vld [vmem:[#allocation3 + $0x274] sm:$0xf] }
 0x15f   :  { %v545_v60 = vpop.f32.mrf.mxu3  ;;  %934 = vmatmul.bf16.gmra.mxu2 %v701_v58  ;;  %1032 = vmatmul.bf16.gmra.mxu0 %v701_v58  ;;  %v497_v1 = vadd.f32 %v496_v59, %v3156_v33 }
 0x160   :  { %v596_v61 = vpop.f32.mrf.mxu0 }
 0x161   :  { %v597_v63 = vadd.f32 %v596_v61, %v3153_v29  ;;  %v645_v0 = vpop.f32.mrf.mxu1  ;;  %v546_v6 = vadd.f32 %v545_v60, %v497_v1  ;;  %v2560_v60 = vor.u32 %v2794_v51, %v2557_v54  ;;  %v2500_v61 = vor.u32 %v2781_v56, %v2499_v55  ;;  %v2775_v51 = vld [vmem:[#allocation3 + $0x244] sm:$0xf0]  ;;  %v2477_v55 = vld [vmem:[#allocation3 + $0x248] sm:$0xf0] }
 0x162   :  { %v2476_v54 = vor.u32 %v2775_v51, %v2475_v50  ;;  %v2445_v50 = vld [vmem:[#allocation3 + $0x208] sm:$0xf0] }
 0x163   :  { %v646_v2 = vadd.f32 %v645_v0, %v597_v63  ;;  %v679_v13 = vmax.f32 %v546_v6, 0.0  ;;  %v2501_v63 = vld [vmem:[#allocation3 + $0x278] sm:$0xf0]  ;;  %1355 = vmatpush.bf16.msrb.mxu2 %v2500_v61  ;;  %1503 = vmatpush.bf16.msrb.mxu1 %v2560_v60  ;;  %v2786_v60 = vld [vmem:[#allocation3 + $0x2a4] sm:$0xf] }
 0x164   :  { %v2504_v0 = vor.u32 %v2780_v62, %v2501_v63 }
 0x165   :  { %v682_v4 = vmax.f32 %v646_v2, 0.0 }
 0x166   :  { %v498_v5 = vpop.f32.mrf.mxu2  ;;  %1453 = vmatpush.bf16.msrb.mxu0 %v2504_v0  ;;  %v2525_v0 = vld [vmem:[#allocation3 + $0x2a8] sm:$0xf0] }
 0x167   :  { %v499_v7 = vadd.f32 %v498_v5, %v3156_v33  ;;  %v547_v9 = vpop.f32.mrf.mxu3  ;;  %v704_v8 = vpack.c.bf16 %v682_v4, %v680_v3  ;;  %v2547_v3 = vld [vmem:[#allocation3 + $0x2d0] sm:$0xf]  ;;  %v2793_v4 = vld [vmem:[#allocation3 + $0x2d4] sm:$0xf0]  ;;  %v2792_v5 = vld [vmem:[#allocation3 + $0x2d4] sm:$0xf] }
 0x168   :  { %v599_v10 = vpop.f32.mrf.mxu0 }
 0x169   :  { %v548_v11 = vadd.f32 %v547_v9, %v499_v7  ;;  %v648_v12 = vpop.f32.mrf.mxu1  ;;  %988 = vmatmul.bf16.gmra.mxu3 %v704_v8  ;;  %1086 = vmatmul.bf16.gmra.mxu1 %v704_v8  ;;  %v600_v15 = vadd.f32 %v599_v10, %v3153_v29  ;;  %v2548_v9 = vor.u32 %v2793_v4, %v2547_v3  ;;  %v2549_v8 = vld [vmem:[#allocation3 + $0x2d8] sm:$0xf0]  ;;  %v2467_v3 = vld [vmem:[#allocation3 + $0x230] sm:$0xf]  ;;  %v2773_v4 = vld [vmem:[#allocation3 + $0x234] sm:$0xf0] }
 0x16b   :  { %v681_v14 = vmax.f32 %v548_v11, 0.0  ;;  %v649_v20 = vadd.f32 %v648_v12, %v600_v15  ;;  %v2552_v11 = vor.u32 %v2792_v5, %v2549_v8  ;;  %v2491_v12 = vld [vmem:[#allocation3 + $0x260] sm:$0xf]  ;;  %1406 = vmatpush.bf16.msrb.mxu3 %v2548_v9  ;;  %v2772_v5 = vld [vmem:[#allocation3 + $0x234] sm:$0xf]  ;;  %v2468_v9 = vor.u32 %v2773_v4, %v2467_v3 }
 0x16c   :  { %v2469_v8 = vld [vmem:[#allocation3 + $0x238] sm:$0xf0] }
 0x16d   :  { %v703_v16 = vpack.c.bf16 %v681_v14, %v679_v13  ;;  %v684_v25 = vmax.f32 %v649_v20, 0.0  ;;  %v2779_v13 = vld [vmem:[#allocation3 + $0x264] sm:$0xf0]  ;;  %v2778_v14 = vld [vmem:[#allocation3 + $0x264] sm:$0xf]  ;;  %1504 = vmatpush.bf16.msrb.mxu1 %v2552_v11 }
 0x16e   :  { %v501_v17 = vpop.f32.mrf.mxu2  ;;  %v2493_v20 = vld [vmem:[#allocation3 + $0x268] sm:$0xf0]  ;;  %v2515_v11 = vld [vmem:[#allocation3 + $0x290] sm:$0xf] }
 0x16f   :  { %v550_v18 = vpop.f32.mrf.mxu3  ;;  %939 = vmatmul.bf16.gmra.mxu2 %v703_v16  ;;  %1037 = vmatmul.bf16.gmra.mxu0 %v703_v16  ;;  %v502_v23 = vadd.f32 %v501_v17, %v3156_v33 }
 0x170   :  { %v601_v19 = vpop.f32.mrf.mxu0 }
 0x171   :  { %v602_v21 = vadd.f32 %v601_v19, %v3153_v29  ;;  %v650_v22 = vpop.f32.mrf.mxu1  ;;  %v551_v28 = vadd.f32 %v550_v18, %v502_v23  ;;  %v2492_v19 = vor.u32 %v2779_v13, %v2491_v12  ;;  %v2785_v12 = vld [vmem:[#allocation3 + $0x294] sm:$0xf0] }
 0x173   :  { %v651_v24 = vadd.f32 %v650_v22, %v602_v21  ;;  %v683_v37 = vmax.f32 %v551_v28, 0.0  ;;  %v2539_v21 = vld [vmem:[#allocation3 + $0x2c0] sm:$0xf]  ;;  %v2791_v22 = vld [vmem:[#allocation3 + $0x2c4] sm:$0xf0]  ;;  %1356 = vmatpush.bf16.msrb.mxu2 %v2492_v19 }
 0x174   :  { %v2459_v19 = vld [vmem:[#allocation3 + $0x220] sm:$0xf] }
 0x175   :  { %v686_v26 = vmax.f32 %v651_v24, 0.0  ;;  %v2496_v24 = vor.u32 %v2778_v14, %v2493_v20  ;;  %v2771_v20 = vld [vmem:[#allocation3 + $0x224] sm:$0xf0] }
 0x176   :  { %v503_v27 = vpop.f32.mrf.mxu2 }
 0x177   :  { %v504_v30 = vadd.f32 %v503_v27, %v3156_v33  ;;  %v552_v31 = vpop.f32.mrf.mxu3  ;;  %v706_v32 = vpack.c.bf16 %v686_v26, %v684_v25  ;;  %v2540_v25 = vor.u32 %v2791_v22, %v2539_v21  ;;  %v2790_v26 = vld [vmem:[#allocation3 + $0x2c4] sm:$0xf]  ;;  %v2541_v27 = vld [vmem:[#allocation3 + $0x2c8] sm:$0xf0]  ;;  %1454 = vmatpush.bf16.msrb.mxu0 %v2496_v24 }
 0x178   :  { %v604_v34 = vpop.f32.mrf.mxu0  ;;  %v2770_v21 = vld [vmem:[#allocation3 + $0x224] sm:$0xf] }
 0x179   :  { %v553_v35 = vadd.f32 %v552_v31, %v504_v30  ;;  %v653_v36 = vpop.f32.mrf.mxu1  ;;  %993 = vmatmul.bf16.gmra.mxu3 %v706_v32  ;;  %1091 = vmatmul.bf16.gmra.mxu1 %v706_v32  ;;  %v605_v44 = vadd.f32 %v604_v34, %v3153_v29  ;;  %v2544_v31 = vor.u32 %v2790_v26, %v2541_v27  ;;  %v2483_v32 = vld [vmem:[#allocation3 + $0x250] sm:$0xf]  ;;  %v2777_v34 = vld [vmem:[#allocation3 + $0x254] sm:$0xf0]  ;;  %v2461_v26 = vld [vmem:[#allocation3 + $0x228] sm:$0xf0] }
 0x17a   :  { %1407 = vmatpush.bf16.msrb.mxu3 %v2540_v25  ;;  %v2460_v25 = vor.u32 %v2771_v20, %v2459_v19 }
 0x17b   :  { %v685_v38 = vmax.f32 %v553_v35, 0.0  ;;  %v654_v57 = vadd.f32 %v653_v36, %v605_v44  ;;  %v2776_v35 = vld [vmem:[#allocation3 + $0x254] sm:$0xf]  ;;  %1505 = vmatpush.bf16.msrb.mxu1 %v2544_v31  ;;  %v2783_v31 = vld [vmem:[#allocation3 + $0x284] sm:$0xf0] }
 0x17c   :  { %v2488_v40 = vor.u32 %v2776_v35, %v2485_v39  ;;  %v2768_v39 = vld [vmem:[#allocation3 + $0x214] sm:$0xf] }
 0x17d   :  { %v705_v45 = vpack.c.bf16 %v685_v38, %v683_v37  ;;  %v688_v6 = vmax.f32 %v654_v57, 0.0  ;;  %v2484_v38 = vor.u32 %v2777_v34, %v2483_v32  ;;  %v2782_v32 = vld [vmem:[#allocation3 + $0x284] sm:$0xf] }
 0x17e   :  { %v506_v47 = vpop.f32.mrf.mxu2  ;;  %1455 = vmatpush.bf16.msrb.mxu0 %v2488_v40 }
 0x17f   :  { %v555_v48 = vpop.f32.mrf.mxu3  ;;  %944 = vmatmul.bf16.gmra.mxu2 %v705_v45  ;;  %1042 = vmatmul.bf16.gmra.mxu0 %v705_v45  ;;  %v507_v1 = vadd.f32 %v506_v47, %v3156_v33  ;;  %v2532_v45 = vor.u32 %v2789_v42, %v2531_v41  ;;  %v2533_v47 = vld [vmem:[#allocation3 + $0x2b8] sm:$0xf0] }
 0x180   :  { %v606_v52 = vpop.f32.mrf.mxu0  ;;  %1357 = vmatpush.bf16.msrb.mxu2 %v2484_v38  ;;  %v2536_v49 = vor.u32 %v2788_v46, %v2533_v47  ;;  %v2451_v38 = vld [vmem:[#allocation3 + $0x210] sm:$0xf]  ;;  %v2443_v46 = vld [vmem:[#allocation3 + $0x200] sm:$0xf]  ;;  %v2767_v47 = vld [vmem:[#allocation3 + $0x204] sm:$0xf0] }
 0x181   :  { %v607_v58 = vadd.f32 %v606_v52, %v3153_v29  ;;  %v655_v59 = vpop.f32.mrf.mxu1  ;;  %v556_v15 = vadd.f32 %v555_v48, %v507_v1  ;;  %v2774_v52 = vld [vmem:[#allocation3 + $0x244] sm:$0xf]  ;;  %1408 = vmatpush.bf16.msrb.mxu3 %v2532_v45 }
 0x182   :  { %1506 = vmatpush.bf16.msrb.mxu1 %v2536_v49  ;;  %v2480_v57 = vor.u32 %v2774_v52, %v2477_v55  ;;  %v2444_v49 = vor.u32 %v2767_v47, %v2443_v46 }
 0x183   :  { %v656_v2 = vadd.f32 %v655_v59, %v607_v58  ;;  %v687_v36 = vmax.f32 %v556_v15, 0.0  ;;  %v2523_v58 = vld [vmem:[#allocation3 + $0x2a0] sm:$0xf]  ;;  %v2787_v59 = vld [vmem:[#allocation3 + $0x2a4] sm:$0xf0]  ;;  %v2516_v15 = vor.u32 %v2785_v12, %v2515_v11 }
 0x184   :  { %v2524_v63 = vor.u32 %v2787_v59, %v2523_v58  ;;  %1358 = vmatpush.bf16.msrb.mxu2 %v2476_v54  ;;  %1456 = vmatpush.bf16.msrb.mxu0 %v2480_v57 }
 0x185   :  { %v690_v7 = vmax.f32 %v656_v2, 0.0  ;;  %v2528_v2 = vor.u32 %v2786_v60, %v2525_v0 }
 0x186   :  { %v508_v10 = vpop.f32.mrf.mxu2  ;;  %1409 = vmatpush.bf16.msrb.mxu3 %v2524_v63 }
 0x187   :  { %v509_v16 = vadd.f32 %v508_v10, %v3156_v33  ;;  %v557_v17 = vpop.f32.mrf.mxu3  ;;  %v708_v18 = vpack.c.bf16 %v690_v7, %v688_v6  ;;  %1507 = vmatpush.bf16.msrb.mxu1 %v2528_v2  ;;  %v2472_v10 = vor.u32 %v2772_v5, %v2469_v8 }
 0x188   :  { %v609_v23 = vpop.f32.mrf.mxu0  ;;  %1359 = vmatpush.bf16.msrb.mxu2 %v2468_v9 }
 0x189   :  { %v558_v28 = vadd.f32 %v557_v17, %v509_v16  ;;  %v658_v30 = vpop.f32.mrf.mxu1  ;;  %998 = vmatmul.bf16.gmra.mxu3 %v708_v18  ;;  %1096 = vmatmul.bf16.gmra.mxu1 %v708_v18  ;;  %v610_v43 = vadd.f32 %v609_v23, %v3153_v29  ;;  %v2517_v16 = vld [vmem:[#allocation3 + $0x298] sm:$0xf0] }
 0x18a   :  { %1457 = vmatpush.bf16.msrb.mxu0 %v2472_v10  ;;  %1410 = vmatpush.bf16.msrb.mxu3 %v2516_v15 }
 0x18b   :  { %v689_v37 = vmax.f32 %v558_v28, 0.0  ;;  %v659_v61 = vadd.f32 %v658_v30, %v610_v43  ;;  %v2464_v28 = vor.u32 %v2770_v21, %v2461_v26  ;;  %v2507_v30 = vld [vmem:[#allocation3 + $0x280] sm:$0xf]  ;;  %v2453_v43 = vld [vmem:[#allocation3 + $0x218] sm:$0xf0] }
 0x18c   :  { %v2508_v35 = vor.u32 %v2783_v31, %v2507_v30  ;;  %1360 = vmatpush.bf16.msrb.mxu2 %v2460_v25 }
 0x18d   :  { %v707_v44 = vpack.c.bf16 %v689_v37, %v687_v36  ;;  %v692_v13 = vmax.f32 %v659_v61, 0.0  ;;  %v2509_v36 = vld [vmem:[#allocation3 + $0x288] sm:$0xf0] }
 0x18e   :  { %v511_v48 = vpop.f32.mrf.mxu2  ;;  %1458 = vmatpush.bf16.msrb.mxu0 %v2464_v28  ;;  %v2512_v37 = vor.u32 %v2782_v32, %v2509_v36  ;;  %1411 = vmatpush.bf16.msrb.mxu3 %v2508_v35 }
 0x18f   :  { %v560_v53 = vpop.f32.mrf.mxu3  ;;  %949 = vmatmul.bf16.gmra.mxu2 %v707_v44  ;;  %1047 = vmatmul.bf16.gmra.mxu0 %v707_v44  ;;  %v512_v6 = vadd.f32 %v511_v48, %v3156_v33  ;;  %v2456_v44 = vor.u32 %v2768_v39, %v2453_v43  ;;  %v2766_v48 = vld [vmem:[#allocation3 + $0x204] sm:$0xf] }
 0x190   :  { %v611_v56 = vpop.f32.mrf.mxu0  ;;  %v2448_v51 = vor.u32 %v2766_v48, %v2445_v50 }
 0x191   :  { %v612_v62 = vadd.f32 %v611_v56, %v3153_v29  ;;  %v660_v1 = vpop.f32.mrf.mxu1  ;;  %v2784_v29 = vld [vmem:[#allocation3 + $0x294] sm:$0xf]  ;;  %v561_v22 = vadd.f32 %v560_v53, %v512_v6  ;;  %v2311_v53 = vld [vmem:[%s3331_s4 + $0x2] sm:$0x3] }
 0x192   :  { %v2520_v18 = vor.u32 %v2784_v29, %v2517_v16  ;;  %1459 = vmatpush.bf16.msrb.mxu0 %v2456_v44  ;;  %v3192_v56 = vperm.slane %v2311_v53, 1  ;;  %v3195_v60 = vperm.slane %v2311_v53, 0 }
 0x193   :  { %v661_v7 = vadd.f32 %v660_v1, %v612_v62  ;;  %v691_v40 = vmax.f32 %v561_v22, 0.0 }
 0x194   :  { %1508 = vmatpush.bf16.msrb.mxu1 %v2520_v18 }
 0x195   :  { %v694_v14 = vmax.f32 %v661_v7, 0.0 }
 0x196   :  { %v513_v17 = vpop.f32.mrf.mxu2  ;;  %1460 = vmatpush.bf16.msrb.mxu0 %v2448_v51 }
 0x197   :  { %v514_v23 = vadd.f32 %v513_v17, %v3156_v33  ;;  %v710_v24 = vpack.c.bf16 %v694_v14, %v692_v13  ;;  %v562_v27 = vpop.f32.mrf.mxu3  ;;  %v2769_v33 = vld [vmem:[#allocation3 + $0x214] sm:$0xf0] }
 0x198   :  { %v2452_v42 = vor.u32 %v2769_v33, %v2451_v38  ;;  %1509 = vmatpush.bf16.msrb.mxu1 %v2512_v37 }
 0x199   :  { %v563_v34 = vadd.f32 %v562_v27, %v514_v23  ;;  %1003 = vmatmul.bf16.gmra.mxu3 %v710_v24  ;;  %1101 = vmatmul.bf16.gmra.mxu1 %v710_v24 }
 0x19a   :  { %1361 = vmatpush.bf16.msrb.mxu2 %v2452_v42 }
 0x19b   :  { %v693_v41 = vmax.f32 %v563_v34, 0.0 }
 0x19d   :  { %v709_v45 = vpack.c.bf16 %v693_v41, %v691_v40 }
 0x19e   :  { %1362 = vmatpush.bf16.msrb.mxu2 %v2444_v49 }
 0x19f   :  { %954 = vmatmul.bf16.gmra.mxu2 %v709_v45  ;;  %1052 = vmatmul.bf16.gmra.mxu0 %v709_v45 }
 0x1a6   :  { %v1067_v52 = vpop.f32.mrf.mxu1 }
 0x1ac   :  { %v969_v54 = vpop.f32.mrf.mxu3  ;;  %v1018_v55 = vpop.f32.mrf.mxu0 }
 0x1ad   :  { %v1019_v58 = vadd.f32 %v1018_v55, %v3192_v56 }
 0x1ae   :  { %v1069_v57 = vpop.f32.mrf.mxu1 }
 0x1af   :  { %v1068_v63 = vadd.f32 %v1067_v52, %v1019_v58 }
 0x1b1   :  { %v1108_v4 = vmax.f32 %v1068_v63, 0.0 }
 0x1b2   :  { %v920_v59 = vpop.f32.mrf.mxu2 }
 0x1b3   :  { %v921_v2 = vadd.f32 %v920_v59, %v3195_v60 }
 0x1b4   :  { %v971_v61 = vpop.f32.mrf.mxu3  ;;  %v1020_v62 = vpop.f32.mrf.mxu0 }
 0x1b5   :  { %v1021_v0 = vadd.f32 %v1020_v62, %v3192_v56  ;;  %v970_v7 = vadd.f32 %v969_v54, %v921_v2 }
 0x1b6   :  { %v1072_v1 = vpop.f32.mrf.mxu1 }
 0x1b7   :  { %v1070_v3 = vadd.f32 %v1069_v57, %v1021_v0  ;;  %v1107_v13 = vmax.f32 %v970_v7, 0.0 }
 0x1b9   :  { %v1110_v5 = vmax.f32 %v1070_v3, 0.0 }
 0x1ba   :  { %v922_v6 = vpop.f32.mrf.mxu2 }
 0x1bb   :  { %v1140_v9 = vpack.c.bf16 %v1110_v5, %v1108_v4  ;;  %v923_v8 = vadd.f32 %v922_v6, %v3195_v60 }
 0x1bc   :  { %v974_v10 = vpop.f32.mrf.mxu3  ;;  %v1023_v11 = vpop.f32.mrf.mxu0 }
 0x1bd   :  { %v972_v12 = vadd.f32 %v971_v61, %v923_v8  ;;  %1412 = vmatmul.bf16.vlgmr.msrb.gmra.mxu3 %v1140_v9  ;;  %1510 = vmatmul.bf16.vlgmr.msrb.gmra.mxu1 %v1140_v9  ;;  %v1024_v16 = vadd.f32 %v1023_v11, %v3192_v56 }
 0x1be   :  { %v1074_v29 = vpop.f32.mrf.mxu1 }
 0x1bf   :  { %v1109_v14 = vmax.f32 %v972_v12, 0.0  ;;  %v1073_v20 = vadd.f32 %v1072_v1, %v1024_v16 }
 0x1c1   :  { %v1139_v15 = vpack.c.bf16 %v1109_v14, %v1107_v13  ;;  %v1112_v25 = vmax.f32 %v1073_v20, 0.0 }
 0x1c2   :  { %v925_v17 = vpop.f32.mrf.mxu2 }
 0x1c3   :  { %1363 = vmatmul.bf16.vlgmr.msrb.gmra.mxu2 %v1139_v15  ;;  %1461 = vmatmul.bf16.vlgmr.msrb.gmra.mxu0 %v1139_v15  ;;  %v926_v23 = vadd.f32 %v925_v17, %v3195_v60 }
 0x1c4   :  { %v976_v18 = vpop.f32.mrf.mxu3  ;;  %v1025_v19 = vpop.f32.mrf.mxu0 }
 0x1c5   :  { %v1026_v21 = vadd.f32 %v1025_v19, %v3192_v56  ;;  %v975_v28 = vadd.f32 %v974_v10, %v926_v23 }
 0x1c6   :  { %v1077_v22 = vpop.f32.mrf.mxu1 }
 0x1c7   :  { %v1075_v24 = vadd.f32 %v1074_v29, %v1026_v21  ;;  %v1111_v37 = vmax.f32 %v975_v28, 0.0 }
 0x1c9   :  { %v1114_v26 = vmax.f32 %v1075_v24, 0.0 }
 0x1ca   :  { %v927_v27 = vpop.f32.mrf.mxu2 }
 0x1cb   :  { %v928_v30 = vadd.f32 %v927_v27, %v3195_v60  ;;  %v1142_v31 = vpack.c.bf16 %v1114_v26, %v1112_v25 }
 0x1cc   :  { %v979_v32 = vpop.f32.mrf.mxu3  ;;  %v1028_v34 = vpop.f32.mrf.mxu0 }
 0x1cd   :  { %v977_v35 = vadd.f32 %v976_v18, %v928_v30  ;;  %1417 = vmatmul.bf16.gmra.mxu3 %v1142_v31  ;;  %1515 = vmatmul.bf16.gmra.mxu1 %v1142_v31  ;;  %v1029_v33 = vadd.f32 %v1028_v34, %v3192_v56 }
 0x1ce   :  { %v1079_v36 = vpop.f32.mrf.mxu1 }
 0x1cf   :  { %v1113_v38 = vmax.f32 %v977_v35, 0.0  ;;  %v1078_v43 = vadd.f32 %v1077_v22, %v1029_v33 }
 0x1d1   :  { %v1141_v39 = vpack.c.bf16 %v1113_v38, %v1111_v37  ;;  %v1116_v48 = vmax.f32 %v1078_v43, 0.0 }
 0x1d2   :  { %v930_v40 = vpop.f32.mrf.mxu2 }
 0x1d3   :  { %1368 = vmatmul.bf16.gmra.mxu2 %v1141_v39  ;;  %1466 = vmatmul.bf16.gmra.mxu0 %v1141_v39  ;;  %v931_v46 = vadd.f32 %v930_v40, %v3195_v60 }
 0x1d4   :  { %v981_v41 = vpop.f32.mrf.mxu3  ;;  %v1030_v42 = vpop.f32.mrf.mxu0 }
 0x1d5   :  { %v1031_v44 = vadd.f32 %v1030_v42, %v3192_v56  ;;  %v980_v51 = vadd.f32 %v979_v32, %v931_v46 }
 0x1d6   :  { %v1082_v45 = vpop.f32.mrf.mxu1 }
 0x1d7   :  { %v1080_v47 = vadd.f32 %v1079_v36, %v1031_v44  ;;  %v1115_v59 = vmax.f32 %v980_v51, 0.0 }
 0x1d9   :  { %v1118_v49 = vmax.f32 %v1080_v47, 0.0 }
 0x1da   :  { %v932_v50 = vpop.f32.mrf.mxu2 }
 0x1db   :  { %v933_v52 = vadd.f32 %v932_v50, %v3195_v60  ;;  %v1144_v53 = vpack.c.bf16 %v1118_v49, %v1116_v48 }
 0x1dc   :  { %v984_v54 = vpop.f32.mrf.mxu3  ;;  %v1033_v55 = vpop.f32.mrf.mxu0 }
 0x1dd   :  { %v982_v57 = vadd.f32 %v981_v41, %v933_v52  ;;  %1422 = vmatmul.bf16.gmra.mxu3 %v1144_v53  ;;  %1520 = vmatmul.bf16.gmra.mxu1 %v1144_v53  ;;  %v1034_v62 = vadd.f32 %v1033_v55, %v3192_v56 }
 0x1de   :  { %v1084_v58 = vpop.f32.mrf.mxu1 }
 0x1df   :  { %v1117_v61 = vmax.f32 %v982_v57, 0.0  ;;  %v1083_v3 = vadd.f32 %v1082_v45, %v1034_v62 }
 0x1e1   :  { %v1143_v63 = vpack.c.bf16 %v1117_v61, %v1115_v59  ;;  %v1120_v9 = vmax.f32 %v1083_v3, 0.0 }
 0x1e2   :  { %v935_v0 = vpop.f32.mrf.mxu2 }
 0x1e3   :  { %1373 = vmatmul.bf16.gmra.mxu2 %v1143_v63  ;;  %1471 = vmatmul.bf16.gmra.mxu0 %v1143_v63  ;;  %v936_v6 = vadd.f32 %v935_v0, %v3195_v60 }
 0x1e4   :  { %v986_v1 = vpop.f32.mrf.mxu3  ;;  %v1035_v2 = vpop.f32.mrf.mxu0 }
 0x1e5   :  { %v1036_v4 = vadd.f32 %v1035_v2, %v3192_v56  ;;  %v985_v11 = vadd.f32 %v984_v54, %v936_v6  ;;  %v2829_v2 = vld [vmem:[#allocation3 + $0x3f4] sm:$0xf0] }
 0x1e6   :  { %v1087_v5 = vpop.f32.mrf.mxu1 }
 0x1e7   :  { %v1085_v7 = vadd.f32 %v1084_v58, %v1036_v4  ;;  %v1119_v17 = vmax.f32 %v985_v11, 0.0  ;;  %v2828_v4 = vld [vmem:[#allocation3 + $0x3f4] sm:$0xf]  ;;  %v2684_v11 = vld [vmem:[#allocation3 + $0x3e0] sm:$0xf] }
 0x1e9   :  { %v1122_v8 = vmax.f32 %v1085_v7, 0.0 }
 0x1ea   :  { %v937_v10 = vpop.f32.mrf.mxu2 }
 0x1eb   :  { %v938_v12 = vadd.f32 %v937_v10, %v3195_v60  ;;  %v1146_v29 = vpack.c.bf16 %v1122_v8, %v1120_v9 }
 0x1ec   :  { %v989_v13 = vpop.f32.mrf.mxu3  ;;  %v1038_v14 = vpop.f32.mrf.mxu0 }
 0x1ed   :  { %v987_v15 = vadd.f32 %v986_v1, %v938_v12  ;;  %1427 = vmatmul.bf16.gmra.mxu3 %v1146_v29  ;;  %1525 = vmatmul.bf16.gmra.mxu1 %v1146_v29  ;;  %v1039_v19 = vadd.f32 %v1038_v14, %v3192_v56  ;;  %v2692_v1 = vld [vmem:[#allocation3 + $0x3f0] sm:$0xf]  ;;  %v2827_v12 = vld [vmem:[#allocation3 + $0x3e4] sm:$0xf0]  ;;  %v2826_v29 = vld [vmem:[#allocation3 + $0x3e4] sm:$0xf] }
 0x1ee   :  { %v1089_v16 = vpop.f32.mrf.mxu1  ;;  %v2693_v3 = vor.u32 %v2829_v2, %v2692_v1  ;;  %v2685_v14 = vor.u32 %v2827_v12, %v2684_v11  ;;  %v2660_v2 = vld [vmem:[#allocation3 + $0x3b0] sm:$0xf]  ;;  %v2604_v12 = vld [vmem:[#allocation3 + $0x340] sm:$0xf] }
 0x1ef   :  { %v1121_v18 = vmax.f32 %v987_v15, 0.0  ;;  %v1088_v24 = vadd.f32 %v1087_v5, %v1039_v19  ;;  %v2694_v5 = vld [vmem:[#allocation3 + $0x3f8] sm:$0xf0]  ;;  %v2686_v15 = vld [vmem:[#allocation3 + $0x3e8] sm:$0xf0] }
 0x1f0   :  { %v2697_v9 = vor.u32 %v2828_v4, %v2694_v5  ;;  %1848 = vmatpush.bf16.msra.mxu3 %v2693_v3  ;;  %v2821_v3 = vld [vmem:[#allocation3 + $0x3b4] sm:$0xf0] }
 0x1f1   :  { %v1145_v20 = vpack.c.bf16 %v1121_v18, %v1119_v17  ;;  %v1124_v30 = vmax.f32 %v1088_v24, 0.0  ;;  %v2813_v17 = vld [vmem:[#allocation3 + $0x374] sm:$0xf0] }
 0x1f2   :  { %v940_v21 = vpop.f32.mrf.mxu2  ;;  %1946 = vmatpush.bf16.msra.mxu1 %v2697_v9  ;;  %v2662_v9 = vld [vmem:[#allocation3 + $0x3b8] sm:$0xf0] }
 0x1f3   :  { %1378 = vmatmul.bf16.gmra.mxu2 %v1145_v20  ;;  %1476 = vmatmul.bf16.gmra.mxu0 %v1145_v20  ;;  %v941_v27 = vadd.f32 %v940_v21, %v3195_v60  ;;  %v2689_v20 = vor.u32 %v2826_v29, %v2686_v15  ;;  %v2807_v29 = vld [vmem:[#allocation3 + $0x344] sm:$0xf0]  ;;  %v2606_v15 = vld [vmem:[#allocation3 + $0x348] sm:$0xf0] }
 0x1f4   :  { %v991_v22 = vpop.f32.mrf.mxu3  ;;  %v1040_v23 = vpop.f32.mrf.mxu0  ;;  %1849 = vmatpush.bf16.msra.mxu3 %v2685_v14  ;;  %v2605_v14 = vor.u32 %v2807_v29, %v2604_v12 }
 0x1f5   :  { %v1041_v25 = vadd.f32 %v1040_v23, %v3192_v56  ;;  %v990_v34 = vadd.f32 %v989_v13, %v941_v27  ;;  %v2630_v23 = vld [vmem:[#allocation3 + $0x378] sm:$0xf0] }
 0x1f6   :  { %v1092_v26 = vpop.f32.mrf.mxu1  ;;  %1947 = vmatpush.bf16.msra.mxu1 %v2689_v20  ;;  %v2818_v20 = vld [vmem:[#allocation3 + $0x3a4] sm:$0xf] }
 0x1f7   :  { %v1090_v28 = vadd.f32 %v1089_v16, %v1041_v25  ;;  %v1123_v40 = vmax.f32 %v990_v34, 0.0  ;;  %v2628_v16 = vld [vmem:[#allocation3 + $0x370] sm:$0xf] }
 0x1f8   :  { %v2629_v21 = vor.u32 %v2813_v17, %v2628_v16 }
 0x1f9   :  { %v1126_v31 = vmax.f32 %v1090_v28, 0.0  ;;  %v2676_v28 = vld [vmem:[#allocation3 + $0x3d0] sm:$0xf] }
 0x1fa   :  { %v942_v32 = vpop.f32.mrf.mxu2  ;;  %1799 = vmatpush.bf16.msra.mxu2 %v2629_v21 }
 0x1fb   :  { %v943_v35 = vadd.f32 %v942_v32, %v3195_v60  ;;  %v1148_v36 = vpack.c.bf16 %v1126_v31, %v1124_v30  ;;  %v2825_v30 = vld [vmem:[#allocation3 + $0x3d4] sm:$0xf0]  ;;  %v2824_v31 = vld [vmem:[#allocation3 + $0x3d4] sm:$0xf] }
 0x1fc   :  { %v994_v37 = vpop.f32.mrf.mxu3  ;;  %v1043_v38 = vpop.f32.mrf.mxu0 }
 0x1fd   :  { %v992_v33 = vadd.f32 %v991_v22, %v943_v35  ;;  %1432 = vmatmul.bf16.gmra.mxu3 %v1148_v36  ;;  %1530 = vmatmul.bf16.gmra.mxu1 %v1148_v36  ;;  %v1044_v42 = vadd.f32 %v1043_v38, %v3192_v56  ;;  %v2812_v22 = vld [vmem:[#allocation3 + $0x374] sm:$0xf]  ;;  %v2677_v35 = vor.u32 %v2825_v30, %v2676_v28  ;;  %v2678_v36 = vld [vmem:[#allocation3 + $0x3d8] sm:$0xf0]  ;;  %v2805_v28 = vld [vmem:[#allocation3 + $0x334] sm:$0xf0] }
 0x1fe   :  { %v1094_v39 = vpop.f32.mrf.mxu1  ;;  %v2633_v24 = vor.u32 %v2812_v22, %v2630_v23  ;;  %v2681_v38 = vor.u32 %v2824_v31, %v2678_v36  ;;  %v2804_v30 = vld [vmem:[#allocation3 + $0x334] sm:$0xf] }
 0x1ff   :  { %v1125_v41 = vmax.f32 %v992_v33, 0.0  ;;  %v1093_v47 = vadd.f32 %v1092_v26, %v1044_v42  ;;  %v2620_v33 = vld [vmem:[#allocation3 + $0x360] sm:$0xf]  ;;  %1850 = vmatpush.bf16.msra.mxu3 %v2677_v35  ;;  %v2598_v35 = vld [vmem:[#allocation3 + $0x338] sm:$0xf0] }
 0x200   :  { %1897 = vmatpush.bf16.msra.mxu0 %v2633_v24  ;;  %1948 = vmatpush.bf16.msra.mxu1 %v2681_v38  ;;  %v2654_v24 = vld [vmem:[#allocation3 + $0x3a8] sm:$0xf0]  ;;  %v2601_v36 = vor.u32 %v2804_v30, %v2598_v35  ;;  %v2817_v38 = vld [vmem:[#allocation3 + $0x394] sm:$0xf0] }
 0x201   :  { %v1147_v43 = vpack.c.bf16 %v1125_v41, %v1123_v40  ;;  %v1128_v52 = vmax.f32 %v1093_v47, 0.0  ;;  %v2810_v40 = vld [vmem:[#allocation3 + $0x364] sm:$0xf]  ;;  %v2823_v47 = vld [vmem:[#allocation3 + $0x3c4] sm:$0xf0] }
 0x202   :  { %v945_v44 = vpop.f32.mrf.mxu2 }
 0x203   :  { %1383 = vmatmul.bf16.gmra.mxu2 %v1147_v43  ;;  %1481 = vmatmul.bf16.gmra.mxu0 %v1147_v43  ;;  %v946_v49 = vadd.f32 %v945_v44, %v3195_v60 }
 0x204   :  { %v996_v45 = vpop.f32.mrf.mxu3  ;;  %v1045_v46 = vpop.f32.mrf.mxu0 }
 0x205   :  { %v1046_v48 = vadd.f32 %v1045_v46, %v3192_v56  ;;  %v995_v55 = vadd.f32 %v994_v37, %v946_v49  ;;  %v2668_v46 = vld [vmem:[#allocation3 + $0x3c0] sm:$0xf] }
 0x206   :  { %v1097_v51 = vpop.f32.mrf.mxu1 }
 0x207   :  { %v1095_v50 = vadd.f32 %v1094_v39, %v1046_v48  ;;  %v1127_v63 = vmax.f32 %v995_v55, 0.0  ;;  %v2811_v39 = vld [vmem:[#allocation3 + $0x364] sm:$0xf0] }
 0x208   :  { %v2621_v44 = vor.u32 %v2811_v39, %v2620_v33 }
 0x209   :  { %v1130_v53 = vmax.f32 %v1095_v50, 0.0 }
 0x20a   :  { %v947_v54 = vpop.f32.mrf.mxu2  ;;  %1800 = vmatpush.bf16.msra.mxu2 %v2621_v44  ;;  %v2588_v44 = vld [vmem:[#allocation3 + $0x320] sm:$0xf] }
 0x20b   :  { %v948_v57 = vadd.f32 %v947_v54, %v3195_v60  ;;  %v1150_v58 = vpack.c.bf16 %v1130_v53, %v1128_v52  ;;  %v2822_v52 = vld [vmem:[#allocation3 + $0x3c4] sm:$0xf]  ;;  %v2670_v53 = vld [vmem:[#allocation3 + $0x3c8] sm:$0xf0] }
 0x20c   :  { %v1048_v59 = vpop.f32.mrf.mxu0  ;;  %v999_v62 = vpop.f32.mrf.mxu3  ;;  %v2673_v55 = vor.u32 %v2822_v52, %v2670_v53 }
 0x20d   :  { %v997_v61 = vadd.f32 %v996_v45, %v948_v57  ;;  %1437 = vmatmul.bf16.gmra.mxu3 %v1150_v58  ;;  %1535 = vmatmul.bf16.gmra.mxu1 %v1150_v58  ;;  %v1049_v6 = vadd.f32 %v1048_v59, %v3192_v56  ;;  %v2622_v45 = vld [vmem:[#allocation3 + $0x368] sm:$0xf0]  ;;  %v2612_v57 = vld [vmem:[#allocation3 + $0x350] sm:$0xf]  ;;  %v2809_v58 = vld [vmem:[#allocation3 + $0x354] sm:$0xf0] }
 0x20e   :  { %v1099_v8 = vpop.f32.mrf.mxu1  ;;  %v2625_v50 = vor.u32 %v2810_v40, %v2622_v45  ;;  %v2808_v59 = vld [vmem:[#allocation3 + $0x354] sm:$0xf]  ;;  %1949 = vmatpush.bf16.msra.mxu1 %v2673_v55  ;;  %v2803_v45 = vld [vmem:[#allocation3 + $0x324] sm:$0xf0] }
 0x20f   :  { %v1129_v0 = vmax.f32 %v997_v61, 0.0  ;;  %v1098_v18 = vadd.f32 %v1097_v51, %v1049_v6  ;;  %v2669_v51 = vor.u32 %v2823_v47, %v2668_v46  ;;  %v2661_v6 = vor.u32 %v2821_v3, %v2660_v2  ;;  %v2802_v46 = vld [vmem:[#allocation3 + $0x324] sm:$0xf]  ;;  %v2815_v55 = vld [vmem:[#allocation3 + $0x384] sm:$0xf0] }
 0x210   :  { %1898 = vmatpush.bf16.msra.mxu0 %v2625_v50  ;;  %v2589_v50 = vor.u32 %v2803_v45, %v2588_v44 }
 0x211   :  { %v1149_v7 = vpack.c.bf16 %v1129_v0, %v1127_v63  ;;  %v1132_v32 = vmax.f32 %v1098_v18, 0.0  ;;  %1851 = vmatpush.bf16.msra.mxu3 %v2669_v51  ;;  %v2613_v63 = vor.u32 %v2809_v58, %v2612_v57  ;;  %v2614_v0 = vld [vmem:[#allocation3 + $0x358] sm:$0xf0]  ;;  %v2652_v18 = vld [vmem:[#allocation3 + $0x3a0] sm:$0xf] }
 0x212   :  { %v950_v10 = vpop.f32.mrf.mxu2  ;;  %v2617_v1 = vor.u32 %v2808_v59, %v2614_v0  ;;  %v2590_v51 = vld [vmem:[#allocation3 + $0x328] sm:$0xf0]  ;;  %v2814_v57 = vld [vmem:[#allocation3 + $0x384] sm:$0xf]  ;;  %v2800_v0 = vld [vmem:[#allocation3 + $0x314] sm:$0xf] }
 0x213   :  { %1388 = vmatmul.bf16.gmra.mxu2 %v1149_v7  ;;  %1486 = vmatmul.bf16.gmra.mxu0 %v1149_v7  ;;  %v951_v25 = vadd.f32 %v950_v10, %v3195_v60  ;;  %v2820_v7 = vld [vmem:[#allocation3 + $0x3b4] sm:$0xf]  ;;  %v2593_v53 = vor.u32 %v2802_v46, %v2590_v51 }
 0x214   :  { %v1050_v13 = vpop.f32.mrf.mxu0  ;;  %v1001_v27 = vpop.f32.mrf.mxu3  ;;  %1801 = vmatpush.bf16.msra.mxu2 %v2613_v63  ;;  %1899 = vmatpush.bf16.msra.mxu0 %v2617_v1  ;;  %v2665_v11 = vor.u32 %v2820_v7, %v2662_v9  ;;  %v2580_v63 = vld [vmem:[#allocation3 + $0x310] sm:$0xf]  ;;  %v2572_v7 = vld [vmem:[#allocation3 + $0x300] sm:$0xf]  ;;  %v2799_v9 = vld [vmem:[#allocation3 + $0x304] sm:$0xf0] }
 0x215   :  { %v1051_v19 = vadd.f32 %v1050_v13, %v3192_v56  ;;  %v1000_v41 = vadd.f32 %v999_v62, %v951_v25  ;;  %v2806_v13 = vld [vmem:[#allocation3 + $0x344] sm:$0xf]  ;;  %1852 = vmatpush.bf16.msra.mxu3 %v2661_v6 }
 0x216   :  { %v1102_v48 = vpop.f32.mrf.mxu1  ;;  %1950 = vmatpush.bf16.msra.mxu1 %v2665_v11  ;;  %v2609_v17 = vor.u32 %v2806_v13, %v2606_v15  ;;  %v2574_v11 = vld [vmem:[#allocation3 + $0x308] sm:$0xf0]  ;;  %v2440_v13 = vld [vmem:[%s3331_s4 + $0x4] sm:$0x3] }
 0x217   :  { %v1100_v26 = vadd.f32 %v1099_v8, %v1051_v19  ;;  %v1131_v61 = vmax.f32 %v1000_v41, 0.0  ;;  %v2819_v19 = vld [vmem:[#allocation3 + $0x3a4] sm:$0xf0]  ;;  %v2646_v41 = vld [vmem:[#allocation3 + $0x398] sm:$0xf0] }
 0x218   :  { %v2653_v23 = vor.u32 %v2819_v19, %v2652_v18  ;;  %1802 = vmatpush.bf16.msra.mxu2 %v2605_v14  ;;  %1900 = vmatpush.bf16.msra.mxu0 %v2609_v17 }
 0x219   :  { %v1134_v34 = vmax.f32 %v1100_v26, 0.0  ;;  %v2657_v26 = vor.u32 %v2818_v20, %v2654_v24  ;;  %v3234_v20 = vperm.slane %v2440_v13, 0 }
 0x21a   :  { %v952_v37 = vpop.f32.mrf.mxu2  ;;  %1853 = vmatpush.bf16.msra.mxu3 %v2653_v23 }
 0x21b   :  { %v953_v42 = vadd.f32 %v952_v37, %v3195_v60  ;;  %v1152_v43 = vpack.c.bf16 %v1134_v34, %v1132_v32  ;;  %1951 = vmatpush.bf16.msra.mxu1 %v2657_v26  ;;  %v2644_v37 = vld [vmem:[#allocation3 + $0x390] sm:$0xf] }
 0x21c   :  { %v1053_v49 = vpop.f32.mrf.mxu0  ;;  %v1004_v8 = vpop.f32.mrf.mxu3  ;;  %v2645_v40 = vor.u32 %v2817_v38, %v2644_v37  ;;  %1901 = vmatpush.bf16.msra.mxu0 %v2601_v36 }
 0x21d   :  { %v1002_v54 = vadd.f32 %v1001_v27, %v953_v42  ;;  %1442 = vmatmul.bf16.gmra.mxu3 %v1152_v43  ;;  %1540 = vmatmul.bf16.gmra.mxu1 %v1152_v43  ;;  %v1054_v4 = vadd.f32 %v1053_v49, %v3192_v56  ;;  %v2596_v27 = vld [vmem:[#allocation3 + $0x330] sm:$0xf] }
 0x21e   :  { %v1104_v25 = vpop.f32.mrf.mxu1  ;;  %v2597_v34 = vor.u32 %v2805_v28, %v2596_v27  ;;  %1854 = vmatpush.bf16.msra.mxu3 %v2645_v40 }
 0x21f   :  { %v1133_v62 = vmax.f32 %v1002_v54, 0.0  ;;  %v1103_v21 = vadd.f32 %v1102_v48, %v1054_v4  ;;  %v2636_v54 = vld [vmem:[#allocation3 + $0x380] sm:$0xf]  ;;  %v2582_v4 = vld [vmem:[#allocation3 + $0x318] sm:$0xf0] }
 0x220   :  { %1803 = vmatpush.bf16.msra.mxu2 %v2597_v34  ;;  %v2637_v59 = vor.u32 %v2815_v55, %v2636_v54  ;;  %1902 = vmatpush.bf16.msra.mxu0 %v2593_v53 }
 0x221   :  { %v1151_v5 = vpack.c.bf16 %v1133_v62, %v1131_v61  ;;  %v1136_v33 = vmax.f32 %v1103_v21, 0.0  ;;  %v2638_v61 = vld [vmem:[#allocation3 + $0x388] sm:$0xf0] }
 0x222   :  { %v955_v10 = vpop.f32.mrf.mxu2  ;;  %v2641_v62 = vor.u32 %v2814_v57, %v2638_v61  ;;  %1855 = vmatpush.bf16.msra.mxu3 %v2637_v59 }
 0x223   :  { %1393 = vmatmul.bf16.gmra.mxu2 %v1151_v5  ;;  %1491 = vmatmul.bf16.gmra.mxu0 %v1151_v5  ;;  %v956_v31 = vadd.f32 %v955_v10, %v3195_v60  ;;  %v2585_v5 = vor.u32 %v2800_v0, %v2582_v4  ;;  %v2573_v10 = vor.u32 %v2799_v9, %v2572_v7 }
 0x224   :  { %v1055_v16 = vpop.f32.mrf.mxu0  ;;  %v1006_v52 = vpop.f32.mrf.mxu3  ;;  %1804 = vmatpush.bf16.msra.mxu2 %v2589_v50 }
 0x225   :  { %v1056_v22 = vadd.f32 %v1055_v16, %v3192_v56  ;;  %v2816_v56 = vld [vmem:[#allocation3 + $0x394] sm:$0xf]  ;;  %v1005_v47 = vadd.f32 %v1004_v8, %v956_v31  ;;  %1903 = vmatpush.bf16.msra.mxu0 %v2585_v5  ;;  %v2798_v8 = vld [vmem:[#allocation3 + $0x304] sm:$0xf]  ;;  %v3231_v16 = vperm.slane %v2440_v13, 1 }
 0x226   :  { %v2649_v43 = vor.u32 %v2816_v56, %v2646_v41  ;;  %v2577_v12 = vor.u32 %v2798_v8, %v2574_v11 }
 0x227   :  { %v1105_v32 = vadd.f32 %v1104_v25, %v1056_v22  ;;  %v1135_v1 = vmax.f32 %v1005_v47, 0.0 }
 0x228   :  { %1952 = vmatpush.bf16.msra.mxu1 %v2649_v43 }
 0x229   :  { %v1138_v39 = vmax.f32 %v1105_v32, 0.0  ;;  %1904 = vmatpush.bf16.msra.mxu0 %v2577_v12 }
 0x22a   :  { %v957_v42 = vpop.f32.mrf.mxu2 }
 0x22b   :  { %v958_v48 = vadd.f32 %v957_v42, %v3195_v60  ;;  %v1154_v49 = vpack.c.bf16 %v1138_v39, %v1136_v33  ;;  %v2801_v60 = vld [vmem:[#allocation3 + $0x314] sm:$0xf0] }
 0x22c   :  { %v2581_v3 = vor.u32 %v2801_v60, %v2580_v63  ;;  %1953 = vmatpush.bf16.msra.mxu1 %v2641_v62 }
 0x22d   :  { %v1007_v58 = vadd.f32 %v1006_v52, %v958_v48  ;;  %1447 = vmatmul.bf16.gmra.mxu3 %v1154_v49  ;;  %1545 = vmatmul.bf16.gmra.mxu1 %v1154_v49 }
 0x22e   :  { %1805 = vmatpush.bf16.msra.mxu2 %v2581_v3 }
 0x22f   :  { %v1137_v2 = vmax.f32 %v1007_v58, 0.0 }
 0x231   :  { %v1153_v6 = vpack.c.bf16 %v1137_v2, %v1135_v1 }
 0x232   :  { %1806 = vmatpush.bf16.msra.mxu2 %v2573_v10 }
 0x233   :  { %1398 = vmatmul.bf16.gmra.mxu2 %v1153_v6  ;;  %1496 = vmatmul.bf16.gmra.mxu0 %v1153_v6 }
 0x23a   :  { %v1511_v29 = vpop.f32.mrf.mxu1 }
 0x240   :  { %v1413_v14 = vpop.f32.mrf.mxu3  ;;  %v1462_v15 = vpop.f32.mrf.mxu0 }
 0x241   :  { %v1463_v18 = vadd.f32 %v1462_v15, %v3231_v16 }
 0x242   :  { %v1513_v17 = vpop.f32.mrf.mxu1 }
 0x243   :  { %v1512_v23 = vadd.f32 %v1511_v29, %v1463_v18 }
 0x245   :  { %v1552_v28 = vmax.f32 %v1512_v23, 0.0 }
 0x246   :  { %v1364_v19 = vpop.f32.mrf.mxu2 }
 0x247   :  { %v1365_v26 = vadd.f32 %v1364_v19, %v3234_v20 }
 0x248   :  { %v1415_v21 = vpop.f32.mrf.mxu3  ;;  %v1464_v22 = vpop.f32.mrf.mxu0 }
 0x249   :  { %v1465_v24 = vadd.f32 %v1464_v22, %v3231_v16  ;;  %v1414_v32 = vadd.f32 %v1413_v14, %v1365_v26 }
 0x24a   :  { %v1516_v25 = vpop.f32.mrf.mxu1 }
 0x24b   :  { %v1514_v27 = vadd.f32 %v1513_v17, %v1465_v24  ;;  %v1551_v33 = vmax.f32 %v1414_v32, 0.0 }
 0x24d   :  { %v1554_v30 = vmax.f32 %v1514_v27, 0.0 }
 0x24e   :  { %v1366_v31 = vpop.f32.mrf.mxu2 }
 0x24f   :  { %v1584_v34 = vpack.c.bf16 %v1554_v30, %v1552_v28  ;;  %v1367_v35 = vadd.f32 %v1366_v31, %v3234_v20 }
 0x250   :  { %v1418_v36 = vpop.f32.mrf.mxu3  ;;  %v1467_v37 = vpop.f32.mrf.mxu0 }
 0x251   :  { %v1416_v38 = vadd.f32 %v1415_v21, %v1367_v35  ;;  %1856 = vmatmul.bf16.vlgmr.msra.gmra.mxu3 %v1584_v34  ;;  %1954 = vmatmul.bf16.vlgmr.msra.gmra.mxu1 %v1584_v34  ;;  %v1468_v41 = vadd.f32 %v1467_v37, %v3231_v16 }
 0x252   :  { %v1518_v56 = vpop.f32.mrf.mxu1 }
 0x253   :  { %v1553_v39 = vmax.f32 %v1416_v38, 0.0  ;;  %v1517_v45 = vadd.f32 %v1516_v25, %v1468_v41 }
 0x255   :  { %v1583_v40 = vpack.c.bf16 %v1553_v39, %v1551_v33  ;;  %v1556_v50 = vmax.f32 %v1517_v45, 0.0 }
 0x256   :  { %v1369_v42 = vpop.f32.mrf.mxu2 }
 0x257   :  { %1807 = vmatmul.bf16.vlgmr.msra.gmra.mxu2 %v1583_v40  ;;  %1905 = vmatmul.bf16.vlgmr.msra.gmra.mxu0 %v1583_v40  ;;  %v1370_v48 = vadd.f32 %v1369_v42, %v3234_v20 }
 0x258   :  { %v1420_v43 = vpop.f32.mrf.mxu3  ;;  %v1469_v44 = vpop.f32.mrf.mxu0 }
 0x259   :  { %v1470_v46 = vadd.f32 %v1469_v44, %v3231_v16  ;;  %v1419_v53 = vadd.f32 %v1418_v36, %v1370_v48 }
 0x25a   :  { %v1521_v47 = vpop.f32.mrf.mxu1 }
 0x25b   :  { %v1519_v49 = vadd.f32 %v1518_v56, %v1470_v46  ;;  %v1555_v62 = vmax.f32 %v1419_v53, 0.0 }
 0x25d   :  { %v1558_v51 = vmax.f32 %v1519_v49, 0.0 }
 0x25e   :  { %v1371_v52 = vpop.f32.mrf.mxu2 }
 0x25f   :  { %v1372_v54 = vadd.f32 %v1371_v52, %v3234_v20  ;;  %v1586_v55 = vpack.c.bf16 %v1558_v51, %v1556_v50 }
 0x260   :  { %v1423_v57 = vpop.f32.mrf.mxu3  ;;  %v1472_v58 = vpop.f32.mrf.mxu0 }
 0x261   :  { %v1421_v59 = vadd.f32 %v1420_v43, %v1372_v54  ;;  %1861 = vmatmul.bf16.gmra.mxu3 %v1586_v55  ;;  %1959 = vmatmul.bf16.gmra.mxu1 %v1586_v55  ;;  %v1473_v60 = vadd.f32 %v1472_v58, %v3231_v16 }
 0x262   :  { %v1523_v61 = vpop.f32.mrf.mxu1 }
 0x263   :  { %v1557_v63 = vmax.f32 %v1421_v59, 0.0  ;;  %v1522_v4 = vadd.f32 %v1521_v47, %v1473_v60 }
 0x265   :  { %v1585_v0 = vpack.c.bf16 %v1557_v63, %v1555_v62  ;;  %v1560_v8 = vmax.f32 %v1522_v4, 0.0 }
 0x266   :  { %v1374_v1 = vpop.f32.mrf.mxu2 }
 0x267   :  { %1812 = vmatmul.bf16.gmra.mxu2 %v1585_v0  ;;  %1910 = vmatmul.bf16.gmra.mxu0 %v1585_v0  ;;  %v1375_v7 = vadd.f32 %v1374_v1, %v3234_v20 }
 0x268   :  { %v1425_v2 = vpop.f32.mrf.mxu3  ;;  %v1474_v3 = vpop.f32.mrf.mxu0 }
 0x269   :  { %v1475_v5 = vadd.f32 %v1474_v3, %v3231_v16  ;;  %v1424_v12 = vadd.f32 %v1423_v57, %v1375_v7 }
 0x26a   :  { %v1526_v6 = vpop.f32.mrf.mxu1 }
 0x26b   :  { %v1524_v9 = vadd.f32 %v1523_v61, %v1475_v5  ;;  %v1559_v19 = vmax.f32 %v1424_v12, 0.0 }
 0x26d   :  { %v1562_v10 = vmax.f32 %v1524_v9, 0.0 }
 0x26e   :  { %v1376_v11 = vpop.f32.mrf.mxu2 }
 0x26f   :  { %v1377_v29 = vadd.f32 %v1376_v11, %v3234_v20  ;;  %v1588_v13 = vpack.c.bf16 %v1562_v10, %v1560_v8 }
 0x270   :  { %v1428_v14 = vpop.f32.mrf.mxu3  ;;  %v1477_v15 = vpop.f32.mrf.mxu0 }
 0x271   :  { %v1426_v17 = vadd.f32 %v1425_v2, %v1377_v29  ;;  %1866 = vmatmul.bf16.gmra.mxu3 %v1588_v13  ;;  %1964 = vmatmul.bf16.gmra.mxu1 %v1588_v13  ;;  %v1478_v22 = vadd.f32 %v1477_v15, %v3231_v16 }
 0x272   :  { %v1528_v18 = vpop.f32.mrf.mxu1 }
 0x273   :  { %v1561_v21 = vmax.f32 %v1426_v17, 0.0  ;;  %v1527_v27 = vadd.f32 %v1526_v6, %v1478_v22 }
 0x275   :  { %v1587_v23 = vpack.c.bf16 %v1561_v21, %v1559_v19  ;;  %v1564_v34 = vmax.f32 %v1527_v27, 0.0 }
 0x276   :  { %v1379_v24 = vpop.f32.mrf.mxu2 }
 0x277   :  { %1817 = vmatmul.bf16.gmra.mxu2 %v1587_v23  ;;  %1915 = vmatmul.bf16.gmra.mxu0 %v1587_v23  ;;  %v1380_v31 = vadd.f32 %v1379_v24, %v3234_v20 }
 0x278   :  { %v1430_v25 = vpop.f32.mrf.mxu3  ;;  %v1479_v26 = vpop.f32.mrf.mxu0 }
 0x279   :  { %v1480_v28 = vadd.f32 %v1479_v26, %v3231_v16  ;;  %v1429_v37 = vadd.f32 %v1428_v14, %v1380_v31 }
 0x27a   :  { %v1531_v30 = vpop.f32.mrf.mxu1 }
 0x27b   :  { %v1529_v32 = vadd.f32 %v1528_v18, %v1480_v28  ;;  %v1563_v42 = vmax.f32 %v1429_v37, 0.0 }
 0x27d   :  { %v1566_v35 = vmax.f32 %v1529_v32, 0.0 }
 0x27e   :  { %v1381_v36 = vpop.f32.mrf.mxu2 }
 0x27f   :  { %v1382_v38 = vadd.f32 %v1381_v36, %v3234_v20  ;;  %v1590_v56 = vpack.c.bf16 %v1566_v35, %v1564_v34 }
 0x280   :  { %v1433_v33 = vpop.f32.mrf.mxu3  ;;  %v1482_v39 = vpop.f32.mrf.mxu0 }
 0x281   :  { %v1431_v40 = vadd.f32 %v1430_v25, %v1382_v38  ;;  %1871 = vmatmul.bf16.gmra.mxu3 %v1590_v56  ;;  %1969 = vmatmul.bf16.gmra.mxu1 %v1590_v56  ;;  %v1483_v44 = vadd.f32 %v1482_v39, %v3231_v16 }
 0x282   :  { %v1533_v41 = vpop.f32.mrf.mxu1 }
 0x283   :  { %v1565_v43 = vmax.f32 %v1431_v40, 0.0  ;;  %v1532_v49 = vadd.f32 %v1531_v30, %v1483_v44 }
 0x285   :  { %v1589_v45 = vpack.c.bf16 %v1565_v43, %v1563_v42  ;;  %v1568_v54 = vmax.f32 %v1532_v49, 0.0 }
 0x286   :  { %v1384_v46 = vpop.f32.mrf.mxu2 }
 0x287   :  { %1822 = vmatmul.bf16.gmra.mxu2 %v1589_v45  ;;  %1920 = vmatmul.bf16.gmra.mxu0 %v1589_v45  ;;  %v1385_v52 = vadd.f32 %v1384_v46, %v3234_v20 }
 0x288   :  { %v1435_v47 = vpop.f32.mrf.mxu3  ;;  %v1484_v48 = vpop.f32.mrf.mxu0 }
 0x289   :  { %v1485_v50 = vadd.f32 %v1484_v48, %v3231_v16  ;;  %v1434_v58 = vadd.f32 %v1433_v33, %v1385_v52 }
 0x28a   :  { %v1536_v51 = vpop.f32.mrf.mxu1 }
 0x28b   :  { %v1534_v53 = vadd.f32 %v1533_v41, %v1485_v50  ;;  %v1567_v1 = vmax.f32 %v1434_v58, 0.0 }
 0x28d   :  { %v1570_v55 = vmax.f32 %v1534_v53, 0.0 }
 0x28e   :  { %v1386_v57 = vpop.f32.mrf.mxu2 }
 0x28f   :  { %v1387_v59 = vadd.f32 %v1386_v57, %v3234_v20  ;;  %v1592_v61 = vpack.c.bf16 %v1570_v55, %v1568_v54 }
 0x290   :  { %v1438_v62 = vpop.f32.mrf.mxu3  ;;  %v1487_v63 = vpop.f32.mrf.mxu0 }
 0x291   :  { %v1436_v60 = vadd.f32 %v1435_v47, %v1387_v59  ;;  %1876 = vmatmul.bf16.gmra.mxu3 %v1592_v61  ;;  %1974 = vmatmul.bf16.gmra.mxu1 %v1592_v61  ;;  %v1488_v3 = vadd.f32 %v1487_v63, %v3231_v16 }
 0x292   :  { %v1538_v0 = vpop.f32.mrf.mxu1 }
 0x293   :  { %v1569_v2 = vmax.f32 %v1436_v60, 0.0  ;;  %v1537_v9 = vadd.f32 %v1536_v51, %v1488_v3 }
 0x295   :  { %v1591_v4 = vpack.c.bf16 %v1569_v2, %v1567_v1  ;;  %v1572_v29 = vmax.f32 %v1537_v9, 0.0 }
 0x296   :  { %v1389_v5 = vpop.f32.mrf.mxu2 }
 0x297   :  { %1827 = vmatmul.bf16.gmra.mxu2 %v1591_v4  ;;  %1925 = vmatmul.bf16.gmra.mxu0 %v1591_v4  ;;  %v1390_v10 = vadd.f32 %v1389_v5, %v3234_v20  ;;  %v2569_v4 = vld [vmem:[%s3331_s4 + $0x6] sm:$0x3] }
 0x298   :  { %v1440_v6 = vpop.f32.mrf.mxu3  ;;  %v1489_v7 = vpop.f32.mrf.mxu0  ;;  %v3270_v5 = vperm.slane %v2569_v4, 1 }
 0x299   :  { %v1490_v8 = vadd.f32 %v1489_v7, %v3231_v16  ;;  %v1439_v15 = vadd.f32 %v1438_v62, %v1390_v10 }
 0x29a   :  { %v1541_v12 = vpop.f32.mrf.mxu1 }
 0x29b   :  { %v1539_v11 = vadd.f32 %v1538_v0, %v1490_v8  ;;  %v1571_v23 = vmax.f32 %v1439_v15, 0.0  ;;  %v3273_v8 = vperm.slane %v2569_v4, 0 }
 0x29d   :  { %v1574_v13 = vmax.f32 %v1539_v11, 0.0 }
 0x29e   :  { %v1391_v14 = vpop.f32.mrf.mxu2 }
 0x29f   :  { %v1392_v17 = vadd.f32 %v1391_v14, %v3234_v20  ;;  %v1594_v18 = vpack.c.bf16 %v1574_v13, %v1572_v29 }
 0x2a0   :  { %v1492_v19 = vpop.f32.mrf.mxu0  ;;  %v1443_v22 = vpop.f32.mrf.mxu3 }
 0x2a1   :  { %v1441_v21 = vadd.f32 %v1440_v6, %v1392_v17  ;;  %1881 = vmatmul.bf16.gmra.mxu3 %v1594_v18  ;;  %1979 = vmatmul.bf16.gmra.mxu1 %v1594_v18  ;;  %v1493_v25 = vadd.f32 %v1492_v19, %v3231_v16 }
 0x2a2   :  { %v1543_v27 = vpop.f32.mrf.mxu1 }
 0x2a3   :  { %v1573_v24 = vmax.f32 %v1441_v21, 0.0  ;;  %v1542_v31 = vadd.f32 %v1541_v12, %v1493_v25 }
 0x2a5   :  { %v1593_v26 = vpack.c.bf16 %v1573_v24, %v1571_v23  ;;  %v1576_v37 = vmax.f32 %v1542_v31, 0.0 }
 0x2a6   :  { %v1394_v28 = vpop.f32.mrf.mxu2 }
 0x2a7   :  { %1832 = vmatmul.bf16.gmra.mxu2 %v1593_v26  ;;  %1930 = vmatmul.bf16.gmra.mxu0 %v1593_v26  ;;  %v1395_v34 = vadd.f32 %v1394_v28, %v3234_v20 }
 0x2a8   :  { %v1494_v30 = vpop.f32.mrf.mxu0  ;;  %v1445_v36 = vpop.f32.mrf.mxu3 }
 0x2a9   :  { %v1495_v32 = vadd.f32 %v1494_v30, %v3231_v16  ;;  %v1444_v33 = vadd.f32 %v1443_v22, %v1395_v34 }
 0x2aa   :  { %v1546_v41 = vpop.f32.mrf.mxu1 }
 0x2ab   :  { %v1544_v35 = vadd.f32 %v1543_v27, %v1495_v32  ;;  %v1575_v44 = vmax.f32 %v1444_v33, 0.0 }
 0x2ad   :  { %v1578_v38 = vmax.f32 %v1544_v35, 0.0 }
 0x2ae   :  { %v1396_v56 = vpop.f32.mrf.mxu2 }
 0x2af   :  { %v1397_v39 = vadd.f32 %v1396_v56, %v3234_v20  ;;  %v1596_v40 = vpack.c.bf16 %v1578_v38, %v1576_v37 }
 0x2b0   :  { %v1497_v42 = vpop.f32.mrf.mxu0  ;;  %v1448_v48 = vpop.f32.mrf.mxu3 }
 0x2b1   :  { %v1446_v43 = vadd.f32 %v1445_v36, %v1397_v39  ;;  %1886 = vmatmul.bf16.gmra.mxu3 %v1596_v40  ;;  %1984 = vmatmul.bf16.gmra.mxu1 %v1596_v40  ;;  %v1498_v46 = vadd.f32 %v1497_v42, %v3231_v16 }
 0x2b2   :  { %v1548_v53 = vpop.f32.mrf.mxu1 }
 0x2b3   :  { %v1577_v45 = vmax.f32 %v1446_v43, 0.0  ;;  %v1547_v51 = vadd.f32 %v1546_v41, %v1498_v46 }
 0x2b5   :  { %v1595_v47 = vpack.c.bf16 %v1577_v45, %v1575_v44  ;;  %v1580_v57 = vmax.f32 %v1547_v51, 0.0 }
 0x2b6   :  { %v1399_v49 = vpop.f32.mrf.mxu2 }
 0x2b7   :  { %1837 = vmatmul.bf16.gmra.mxu2 %v1595_v47  ;;  %1935 = vmatmul.bf16.gmra.mxu0 %v1595_v47  ;;  %v1400_v54 = vadd.f32 %v1399_v49, %v3234_v20 }
 0x2b8   :  { %v1499_v50 = vpop.f32.mrf.mxu0  ;;  %v1450_v60 = vpop.f32.mrf.mxu3 }
 0x2b9   :  { %v1500_v52 = vadd.f32 %v1499_v50, %v3231_v16  ;;  %v1449_v61 = vadd.f32 %v1448_v48, %v1400_v54 }
 0x2bb   :  { %v1549_v55 = vadd.f32 %v1548_v53, %v1500_v52  ;;  %v1579_v1 = vmax.f32 %v1449_v61, 0.0 }
 0x2bd   :  { %v1582_v58 = vmax.f32 %v1549_v55, 0.0 }
 0x2be   :  { %v1401_v59 = vpop.f32.mrf.mxu2 }
 0x2bf   :  { %v1402_v62 = vadd.f32 %v1401_v59, %v3234_v20  ;;  %v1598_v63 = vpack.c.bf16 %v1582_v58, %v1580_v57 }
 0x2c1   :  { %v1451_v0 = vadd.f32 %v1450_v60, %v1402_v62  ;;  %1891 = vmatmul.bf16.gmra.mxu3 %v1598_v63  ;;  %1989 = vmatmul.bf16.gmra.mxu1 %v1598_v63 }
 0x2c3   :  { %v1581_v2 = vmax.f32 %v1451_v0, 0.0 }
 0x2c5   :  { %v1597_v3 = vpack.c.bf16 %v1581_v2, %v1579_v1 }
 0x2c7   :  { %1842 = vmatmul.bf16.gmra.mxu2 %v1597_v3  ;;  %1940 = vmatmul.bf16.gmra.mxu0 %v1597_v3 }
 0x2ce   :  { %v1955_v16 = vpop.f32.mrf.mxu1 }
 0x2d4   :  { %v1857_v6 = vpop.f32.mrf.mxu3  ;;  %v1906_v7 = vpop.f32.mrf.mxu0 }
 0x2d5   :  { %v1907_v9 = vadd.f32 %v1906_v7, %v3270_v5 }
 0x2d6   :  { %v1957_v20 = vpop.f32.mrf.mxu1 }
 0x2d7   :  { %v1956_v12 = vadd.f32 %v1955_v16, %v1907_v9 }
 0x2d9   :  { %v1996_v19 = vmax.f32 %v1956_v12, 0.0 }
 0x2da   :  { %v1808_v10 = vpop.f32.mrf.mxu2 }
 0x2db   :  { %v1809_v11 = vadd.f32 %v1808_v10, %v3273_v8 }
 0x2dc   :  { %v1859_v29 = vpop.f32.mrf.mxu3  ;;  %v1908_v13 = vpop.f32.mrf.mxu0 }
 0x2dd   :  { %v1858_v14 = vadd.f32 %v1857_v6, %v1809_v11  ;;  %v1909_v17 = vadd.f32 %v1908_v13, %v3270_v5 }
 0x2de   :  { %v1960_v15 = vpop.f32.mrf.mxu1 }
 0x2df   :  { %v1995_v18 = vmax.f32 %v1858_v14, 0.0  ;;  %v1958_v23 = vadd.f32 %v1957_v20, %v1909_v17 }
 0x2e1   :  { %v2837_v21 = vpack.i.bf16 %v1996_v19, %v1995_v18  ;;  %v1998_v30 = vmax.f32 %v1958_v23, 0.0 }
 0x2e2   :  { %v1810_v22 = vpop.f32.mrf.mxu2 }
 0x2e3   :  { %v1811_v24 = vadd.f32 %v1810_v22, %v3273_v8  ;;  %2838 = vxpose.xlu0.b32.start [1/16] %v2837_v21, 128 }
 0x2e4   :  { %v1862_v25 = vpop.f32.mrf.mxu3  ;;  %v1911_v26 = vpop.f32.mrf.mxu0 }
 0x2e5   :  { %v1860_v27 = vadd.f32 %v1859_v29, %v1811_v24  ;;  %v1912_v32 = vadd.f32 %v1911_v26, %v3270_v5 }
 0x2e6   :  { %v1962_v28 = vpop.f32.mrf.mxu1 }
 0x2e7   :  { %v1997_v31 = vmax.f32 %v1860_v27, 0.0  ;;  %v1961_v36 = vadd.f32 %v1960_v15, %v1912_v32 }
 0x2e9   :  { %v2839_v34 = vpack.i.bf16 %v1998_v30, %v1997_v31  ;;  %v2000_v40 = vmax.f32 %v1961_v36, 0.0 }
 0x2ea   :  { %v1813_v35 = vpop.f32.mrf.mxu2 }
 0x2eb   :  { %v1814_v37 = vadd.f32 %v1813_v35, %v3273_v8  ;;  %2840 = vxpose.xlu0.b32.cont [2/16] %v2839_v34, 128 }
 0x2ec   :  { %v1864_v38 = vpop.f32.mrf.mxu3  ;;  %v1913_v56 = vpop.f32.mrf.mxu0 }
 0x2ed   :  { %v1863_v33 = vadd.f32 %v1862_v25, %v1814_v37  ;;  %v1914_v42 = vadd.f32 %v1913_v56, %v3270_v5 }
 0x2ee   :  { %v1965_v39 = vpop.f32.mrf.mxu1 }
 0x2ef   :  { %v1999_v41 = vmax.f32 %v1863_v33, 0.0  ;;  %v1963_v45 = vadd.f32 %v1962_v28, %v1914_v42 }
 0x2f1   :  { %v2841_v43 = vpack.i.bf16 %v2000_v40, %v1999_v41  ;;  %v2002_v51 = vmax.f32 %v1963_v45, 0.0 }
 0x2f2   :  { %v1815_v44 = vpop.f32.mrf.mxu2 }
 0x2f3   :  { %v1816_v46 = vadd.f32 %v1815_v44, %v3273_v8  ;;  %2842 = vxpose.xlu0.b32.cont [3/16] %v2841_v43, 128 }
 0x2f4   :  { %v1867_v47 = vpop.f32.mrf.mxu3  ;;  %v1916_v48 = vpop.f32.mrf.mxu0 }
 0x2f5   :  { %v1865_v49 = vadd.f32 %v1864_v38, %v1816_v46  ;;  %v1917_v53 = vadd.f32 %v1916_v48, %v3270_v5 }
 0x2f6   :  { %v1967_v50 = vpop.f32.mrf.mxu1 }
 0x2f7   :  { %v2001_v52 = vmax.f32 %v1865_v49, 0.0  ;;  %v1966_v57 = vadd.f32 %v1965_v39, %v1917_v53 }
 0x2f9   :  { %v2843_v54 = vpack.i.bf16 %v2002_v51, %v2001_v52  ;;  %v2004_v60 = vmax.f32 %v1966_v57, 0.0 }
 0x2fa   :  { %v1818_v55 = vpop.f32.mrf.mxu2 }
 0x2fb   :  { %v1819_v58 = vadd.f32 %v1818_v55, %v3273_v8  ;;  %2844 = vxpose.xlu0.b32.cont [4/16] %v2843_v54, 128 }
 0x2fc   :  { %v1869_v59 = vpop.f32.mrf.mxu3  ;;  %v1918_v61 = vpop.f32.mrf.mxu0 }
 0x2fd   :  { %v1868_v62 = vadd.f32 %v1867_v47, %v1819_v58  ;;  %v1919_v1 = vadd.f32 %v1918_v61, %v3270_v5 }
 0x2fe   :  { %v1970_v63 = vpop.f32.mrf.mxu1 }
 0x2ff   :  { %v2003_v0 = vmax.f32 %v1868_v62, 0.0  ;;  %v1968_v16 = vadd.f32 %v1967_v50, %v1919_v1 }
 0x301   :  { %v2845_v2 = vpack.i.bf16 %v2004_v60, %v2003_v0  ;;  %v2006_v10 = vmax.f32 %v1968_v16, 0.0 }
 0x302   :  { %v1820_v3 = vpop.f32.mrf.mxu2 }
 0x303   :  { %v1821_v4 = vadd.f32 %v1820_v3, %v3273_v8  ;;  %2846 = vxpose.xlu0.b32.cont [5/16] %v2845_v2, 128 }
 0x304   :  { %v1872_v6 = vpop.f32.mrf.mxu3  ;;  %v1921_v7 = vpop.f32.mrf.mxu0 }
 0x305   :  { %v1870_v20 = vadd.f32 %v1869_v59, %v1821_v4  ;;  %v1922_v12 = vadd.f32 %v1921_v7, %v3270_v5 }
 0x306   :  { %v1972_v9 = vpop.f32.mrf.mxu1 }
 0x307   :  { %v2005_v11 = vmax.f32 %v1870_v20, 0.0  ;;  %v1971_v14 = vadd.f32 %v1970_v63, %v1922_v12 }
 0x309   :  { %v2847_v29 = vpack.i.bf16 %v2006_v10, %v2005_v11  ;;  %v2008_v22 = vmax.f32 %v1971_v14, 0.0 }
 0x30a   :  { %v1823_v13 = vpop.f32.mrf.mxu2 }
 0x30b   :  { %v1824_v15 = vadd.f32 %v1823_v13, %v3273_v8  ;;  %2848 = vxpose.xlu0.b32.cont [6/16] %v2847_v29, 128 }
 0x30c   :  { %v1874_v17 = vpop.f32.mrf.mxu3  ;;  %v1923_v18 = vpop.f32.mrf.mxu0 }
 0x30d   :  { %v1873_v19 = vadd.f32 %v1872_v6, %v1824_v15  ;;  %v1924_v24 = vadd.f32 %v1923_v18, %v3270_v5 }
 0x30e   :  { %v1975_v21 = vpop.f32.mrf.mxu1 }
 0x30f   :  { %v2007_v23 = vmax.f32 %v1873_v19, 0.0  ;;  %v1973_v27 = vadd.f32 %v1972_v9, %v1924_v24 }
 0x311   :  { %v2849_v25 = vpack.i.bf16 %v2008_v22, %v2007_v23  ;;  %v2010_v35 = vmax.f32 %v1973_v27, 0.0 }
 0x312   :  { %v1825_v26 = vpop.f32.mrf.mxu2 }
 0x313   :  { %v1826_v28 = vadd.f32 %v1825_v26, %v3273_v8  ;;  %2850 = vxpose.xlu0.b32.cont [7/16] %v2849_v25, 128 }
 0x314   :  { %v1877_v30 = vpop.f32.mrf.mxu3  ;;  %v1926_v31 = vpop.f32.mrf.mxu0 }
 0x315   :  { %v1875_v32 = vadd.f32 %v1874_v17, %v1826_v28  ;;  %v1927_v37 = vadd.f32 %v1926_v31, %v3270_v5 }
 0x316   :  { %v1977_v34 = vpop.f32.mrf.mxu1 }
 0x317   :  { %v2009_v36 = vmax.f32 %v1875_v32, 0.0  ;;  %v1976_v33 = vadd.f32 %v1975_v21, %v1927_v37 }
 0x319   :  { %v2851_v38 = vpack.i.bf16 %v2010_v35, %v2009_v36  ;;  %v2012_v43 = vmax.f32 %v1976_v33, 0.0 }
 0x31a   :  { %v1828_v56 = vpop.f32.mrf.mxu2 }
 0x31b   :  { %v1829_v39 = vadd.f32 %v1828_v56, %v3273_v8  ;;  %2852 = vxpose.xlu0.b32.cont [8/16] %v2851_v38, 128 }
 0x31c   :  { %v1879_v40 = vpop.f32.mrf.mxu3  ;;  %v1928_v41 = vpop.f32.mrf.mxu0 }
 0x31d   :  { %v1878_v42 = vadd.f32 %v1877_v30, %v1829_v39  ;;  %v1929_v45 = vadd.f32 %v1928_v41, %v3270_v5 }
 0x31e   :  { %v1980_v46 = vpop.f32.mrf.mxu1 }
 0x31f   :  { %v2011_v44 = vmax.f32 %v1878_v42, 0.0  ;;  %v1978_v49 = vadd.f32 %v1977_v34, %v1929_v45 }
 0x321   :  { %v2853_v47 = vpack.i.bf16 %v2012_v43, %v2011_v44  ;;  %v2014_v54 = vmax.f32 %v1978_v49, 0.0 }
 0x322   :  { %v1830_v48 = vpop.f32.mrf.mxu2 }
 0x323   :  { %v1831_v50 = vadd.f32 %v1830_v48, %v3273_v8  ;;  %2854 = vxpose.xlu0.b32.cont [9/16] %v2853_v47, 128 }
 0x324   :  { %v1882_v51 = vpop.f32.mrf.mxu3  ;;  %v1931_v52 = vpop.f32.mrf.mxu0 }
 0x325   :  { %v1880_v53 = vadd.f32 %v1879_v40, %v1831_v50  ;;  %v1932_v57 = vadd.f32 %v1931_v52, %v3270_v5 }
 0x326   :  { %v1982_v59 = vpop.f32.mrf.mxu1 }
 0x327   :  { %v2013_v55 = vmax.f32 %v1880_v53, 0.0  ;;  %v1981_v62 = vadd.f32 %v1980_v46, %v1932_v57 }
 0x329   :  { %v2855_v58 = vpack.i.bf16 %v2014_v54, %v2013_v55  ;;  %v2016_v2 = vmax.f32 %v1981_v62, 0.0 }
 0x32a   :  { %v1833_v61 = vpop.f32.mrf.mxu2 }
 0x32b   :  { %v1834_v63 = vadd.f32 %v1833_v61, %v3273_v8  ;;  %2856 = vxpose.xlu0.b32.cont [10/16] %v2855_v58, 128 }
 0x32c   :  { %v1884_v60 = vpop.f32.mrf.mxu3  ;;  %v1933_v0 = vpop.f32.mrf.mxu0 }
 0x32d   :  { %v1883_v1 = vadd.f32 %v1882_v51, %v1834_v63  ;;  %v1934_v16 = vadd.f32 %v1933_v0, %v3270_v5 }
 0x32e   :  { %v1985_v9 = vpop.f32.mrf.mxu1 }
 0x32f   :  { %v2015_v3 = vmax.f32 %v1883_v1, 0.0  ;;  %v1983_v7 = vadd.f32 %v1982_v59, %v1934_v16 }
 0x331   :  { %v2857_v4 = vpack.i.bf16 %v2016_v2, %v2015_v3  ;;  %v2018_v29 = vmax.f32 %v1983_v7, 0.0 }
 0x332   :  { %v1835_v6 = vpop.f32.mrf.mxu2 }
 0x333   :  { %v1836_v20 = vadd.f32 %v1835_v6, %v3273_v8  ;;  %2858 = vxpose.xlu0.b32.cont [11/16] %v2857_v4, 128 }
 0x334   :  { %v1936_v10 = vpop.f32.mrf.mxu0  ;;  %v1887_v12 = vpop.f32.mrf.mxu3 }
 0x335   :  { %v1885_v11 = vadd.f32 %v1884_v60, %v1836_v20  ;;  %v1937_v14 = vadd.f32 %v1936_v10, %v3270_v5 }
 0x336   :  { %v1987_v23 = vpop.f32.mrf.mxu1 }
 0x337   :  { %v2017_v13 = vmax.f32 %v1885_v11, 0.0  ;;  %v1986_v18 = vadd.f32 %v1985_v9, %v1937_v14 }
 0x339   :  { %v2859_v15 = vpack.i.bf16 %v2018_v29, %v2017_v13  ;;  %v2020_v24 = vmax.f32 %v1986_v18, 0.0 }
 0x33a   :  { %v1838_v17 = vpop.f32.mrf.mxu2 }
 0x33b   :  { %v1839_v19 = vadd.f32 %v1838_v17, %v3273_v8  ;;  %2860 = vxpose.xlu0.b32.cont [12/16] %v2859_v15, 128 }
 0x33c   :  { %v1938_v21 = vpop.f32.mrf.mxu0  ;;  %v1889_v27 = vpop.f32.mrf.mxu3 }
 0x33d   :  { %v1888_v22 = vadd.f32 %v1887_v12, %v1839_v19  ;;  %v1939_v26 = vadd.f32 %v1938_v21, %v3270_v5 }
 0x33e   :  { %v1990_v56 = vpop.f32.mrf.mxu1 }
 0x33f   :  { %v2019_v25 = vmax.f32 %v1888_v22, 0.0  ;;  %v1988_v31 = vadd.f32 %v1987_v23, %v1939_v26 }
 0x341   :  { %v2861_v28 = vpack.i.bf16 %v2020_v24, %v2019_v25  ;;  %v2022_v36 = vmax.f32 %v1988_v31, 0.0 }
 0x342   :  { %v1840_v30 = vpop.f32.mrf.mxu2 }
 0x343   :  { %v1841_v32 = vadd.f32 %v1840_v30, %v3273_v8  ;;  %2862 = vxpose.xlu0.b32.cont [13/16] %v2861_v28, 128 }
 0x344   :  { %v1941_v34 = vpop.f32.mrf.mxu0  ;;  %v1892_v39 = vpop.f32.mrf.mxu3 }
 0x345   :  { %v1890_v35 = vadd.f32 %v1889_v27, %v1841_v32  ;;  %v1942_v38 = vadd.f32 %v1941_v34, %v3270_v5 }
 0x346   :  { %v1992_v49 = vpop.f32.mrf.mxu1 }
 0x347   :  { %v2021_v37 = vmax.f32 %v1890_v35, 0.0  ;;  %v1991_v41 = vadd.f32 %v1990_v56, %v1942_v38 }
 0x349   :  { %v2863_v33 = vpack.i.bf16 %v2022_v36, %v2021_v37  ;;  %v2024_v45 = vmax.f32 %v1991_v41, 0.0 }
 0x34a   :  { %v1843_v40 = vpop.f32.mrf.mxu2 }
 0x34b   :  { %v1844_v42 = vadd.f32 %v1843_v40, %v3273_v8  ;;  %2864 = vxpose.xlu0.b32.cont [14/16] %v2863_v33, 128 }
 0x34c   :  { %v1943_v43 = vpop.f32.mrf.mxu0  ;;  %v1894_v53 = vpop.f32.mrf.mxu3 }
 0x34d   :  { %v1893_v44 = vadd.f32 %v1892_v39, %v1844_v42  ;;  %v1944_v47 = vadd.f32 %v1943_v43, %v3270_v5 }
 0x34f   :  { %v2023_v46 = vmax.f32 %v1893_v44, 0.0  ;;  %v1993_v51 = vadd.f32 %v1992_v49, %v1944_v47 }
 0x351   :  { %v2865_v48 = vpack.i.bf16 %v2024_v45, %v2023_v46  ;;  %v2026_v55 = vmax.f32 %v1993_v51, 0.0 }
 0x352   :  { %v1845_v50 = vpop.f32.mrf.mxu2 }
 0x353   :  { %v1846_v52 = vadd.f32 %v1845_v50, %v3273_v8  ;;  %2866 = vxpose.xlu0.b32.cont [15/16] %v2865_v48, 128 }
 0x355   :  { %v1895_v54 = vadd.f32 %v1894_v53, %v1846_v52 }
 0x357   :  { %v2025_v57 = vmax.f32 %v1895_v54, 0.0 }
 0x359   :  { %v2867_v58 = vpack.i.bf16 %v2026_v55, %v2025_v57 }
 0x35b   :  { %2868 = vxpose.xlu0.b32.end [16/16] %v2867_v58, 128 }
 0x387   :  { %v2869_v59 = vpop.trf.xlu0 }
 0x388   :  { %v2873_v61 = vunpack.i.h.bf16 %v2869_v59  ;;  %v2870_v62 = vunpack.i.l.bf16 %v2869_v59  ;;  %v2107_v59 = vld [vmem:[%s3332_s5] sm:$0xff] }
 0x38f   :  { %v2874_v63 = vpop.trf.xlu0 }
 0x390   :  { %v2878_v60 = vunpack.i.h.bf16 %v2874_v63  ;;  %v2875_v0 = vunpack.i.l.bf16 %v2874_v63 }
 0x392   :  { %v3306_v5 = vpack.c.bf16 %v2875_v0, %v2870_v62  ;;  %v3308_v1 = vpack.c.bf16 %v2878_v60, %v2873_v61  ;;  %v2109_v61 = vunpack.c.l.b16 %v2107_v59  ;;  %v2110_v62 = vunpack.c.h.b16 %v2107_v59 }
 0x394   :  { %v2111_v63 = vpack.c.b16 %v2109_v61, %v2109_v61  ;;  %v2112_v60 = vpack.c.b16 %v2110_v62, %v2110_v62 }
 0x397   :  { %v2879_v2 = vpop.trf.xlu0 }
 0x398   :  { %v2883_v3 = vunpack.i.h.bf16 %v2879_v2  ;;  %v2880_v8 = vunpack.i.l.bf16 %v2879_v2 }
 0x39f   :  { %v2884_v16 = vpop.trf.xlu0 }
 0x3a0   :  { %v2888_v4 = vunpack.i.h.bf16 %v2884_v16  ;;  %v2885_v6 = vunpack.i.l.bf16 %v2884_v16 }
 0x3a2   :  { %v3310_v7 = vpack.c.bf16 %v2885_v6, %v2880_v8  ;;  %v3312_v20 = vpack.c.bf16 %v2888_v4, %v2883_v3  ;;  %v2142_v3 = vstv %s3333_s6 }
 0x3a7   :  { %v2889_v9 = vpop.trf.xlu0 }
 0x3a8   :  { %v2893_v10 = vunpack.i.h.bf16 %v2889_v9  ;;  %v2890_v11 = vunpack.i.l.bf16 %v2889_v9 }
 0x3af   :  { %v2894_v12 = vpop.trf.xlu0 }
 0x3b0   :  { %v2898_v29 = vunpack.i.h.bf16 %v2894_v12  ;;  %v2895_v13 = vunpack.i.l.bf16 %v2894_v12 }
 0x3b2   :  { %v2093_v14 = vpack.c.bf16 %v2895_v13, %v2890_v11  ;;  %v2101_v15 = vpack.c.bf16 %v2898_v29, %v2893_v10 }
 0x3b7   :  { %v2899_v17 = vpop.trf.xlu0 }
 0x3b8   :  { %v2903_v18 = vunpack.i.h.bf16 %v2899_v17  ;;  %v2900_v19 = vunpack.i.l.bf16 %v2899_v17 }
 0x3bf   :  { %v2904_v21 = vpop.trf.xlu0 }
 0x3c0   :  { %v2908_v22 = vunpack.i.h.bf16 %v2904_v21  ;;  %v2905_v23 = vunpack.i.l.bf16 %v2904_v21 }
 0x3c2   :  { %v2094_v24 = vpack.c.bf16 %v2905_v23, %v2900_v19  ;;  %v2102_v25 = vpack.c.bf16 %v2908_v22, %v2903_v18 }
 0x3c7   :  { %v2909_v26 = vpop.trf.xlu0 }
 0x3c8   :  { %v2913_v54 = vunpack.i.h.bf16 %v2909_v26  ;;  %v2910_v55 = vunpack.i.l.bf16 %v2909_v26 }
 0x3cf   :  { %v2914_v27 = vpop.trf.xlu0 }
 0x3d0   :  { %v2918_v50 = vunpack.i.h.bf16 %v2914_v27  ;;  %v2915_v51 = vunpack.i.l.bf16 %v2914_v27 }
 0x3d2   :  { %v2095_v57 = vpack.c.bf16 %v2915_v51, %v2910_v55  ;;  %v2103_v58 = vpack.c.bf16 %v2918_v50, %v2913_v54 }
 0x3d7   :  { %v2919_v28 = vpop.trf.xlu0 }
 0x3d8   :  { %v2923_v48 = vunpack.i.h.bf16 %v2919_v28  ;;  %v2920_v49 = vunpack.i.l.bf16 %v2919_v28 }
 0x3df   :  { %v2924_v30 = vpop.trf.xlu0 }
 0x3e0   :  { %v2928_v44 = vunpack.i.h.bf16 %v2924_v30  ;;  %v2925_v45 = vunpack.i.l.bf16 %v2924_v30 }
 0x3e2   :  { %v2096_v52 = vpack.c.bf16 %v2925_v45, %v2920_v49  ;;  %v2104_v53 = vpack.c.bf16 %v2928_v44, %v2923_v48 }
 0x3e7   :  { %v2929_v31 = vpop.trf.xlu0 }
 0x3e8   :  { %v2933_v42 = vunpack.i.h.bf16 %v2929_v31  ;;  %v2930_v43 = vunpack.i.l.bf16 %v2929_v31 }
 0x3ef   :  { %v2934_v32 = vpop.trf.xlu0 }
 0x3f0   :  { %v2938_v33 = vunpack.i.h.bf16 %v2934_v32  ;;  %v2935_v39 = vunpack.i.l.bf16 %v2934_v32 }
 0x3f2   :  { %v2097_v46 = vpack.c.bf16 %v2935_v39, %v2930_v43  ;;  %v2105_v47 = vpack.c.bf16 %v2938_v33, %v2933_v42 }
 0x3f7   :  { %v2939_v34 = vpop.trf.xlu0 }
 0x3f8   :  { %v2943_v35 = vunpack.i.h.bf16 %v2939_v34  ;;  %v2940_v36 = vunpack.i.l.bf16 %v2939_v34 }
 0x3ff   :  { %v2944_v37 = vpop.trf.xlu0 }
 0x400   :  { %v2948_v38 = vunpack.i.h.bf16 %v2944_v37  ;;  %v2945_v56 = vunpack.i.l.bf16 %v2944_v37 }
 0x402   :  { %v2098_v40 = vpack.c.bf16 %v2945_v56, %v2940_v36  ;;  %v2106_v41 = vpack.c.bf16 %v2948_v38, %v2943_v35 }
 0x404   :  { %2115 = vmatpush.bf16.msrb.mxu2 %v2098_v40  ;;  %2128 = vmatpush.bf16.msrb.mxu3 %v2106_v41 }
 0x408   :  { %2116 = vmatpush.bf16.msrb.mxu2 %v2097_v46  ;;  %2129 = vmatpush.bf16.msrb.mxu3 %v2105_v47 }
 0x40c   :  { %2117 = vmatpush.bf16.msrb.mxu2 %v2096_v52  ;;  %2130 = vmatpush.bf16.msrb.mxu3 %v2104_v53 }
 0x410   :  { %2118 = vmatpush.bf16.msrb.mxu2 %v2095_v57  ;;  %2131 = vmatpush.bf16.msrb.mxu3 %v2103_v58 }
 0x414   :  { %2119 = vmatpush.bf16.msrb.mxu2 %v2094_v24  ;;  %2132 = vmatpush.bf16.msrb.mxu3 %v2102_v25 }
 0x418   :  { %2120 = vmatpush.bf16.msrb.mxu2 %v2093_v14  ;;  %2133 = vmatpush.bf16.msrb.mxu3 %v2101_v15 }
 0x41c   :  { %2121 = vmatpush.bf16.msrb.mxu2 %v3310_v7  ;;  %2134 = vmatpush.bf16.msrb.mxu3 %v3312_v20 }
 0x420   :  { %2122 = vmatpush.bf16.msrb.mxu2 %v3306_v5  ;;  %2135 = vmatpush.bf16.msrb.mxu3 %v3308_v1 }
 0x423   :  { %2123 = vmatmul.bf16.vlgmr.msrb.gmra.mxu2 %v2111_v63  ;;  %2136 = vmatmul.bf16.vlgmr.msrb.gmra.mxu3 %v2112_v60 }
 0x4a6   :  { %v2124_v0 = vpop.f32.mrf.mxu2  ;;  %v2137_v2 = vpop.f32.mrf.mxu3 }
 0x4a7   :  { %v2138_v8 = vadd.f32 %v2137_v2, %v2124_v0 }
 0x4a9   :  { %v2143_v16 = vadd.f32 %v2142_v3, %v2138_v8 }
 0x4ab   :  { %2949 = vtanh.f32 %v2143_v16 }
 0x4ae   :  { %v2126_v4 = vpop.f32.mrf.mxu2  ;;  %v2139_v6 = vpop.f32.mrf.mxu3 }
 0x4b1   :  { %v2950_v7 = vpop.eup %2949 }
 0x4b2   :  { %2145 = vst [vmem:[%s3334_s7] sm:$0x1] %v2950_v7 }
 0x4b3   :  { %2150 = vsyncpa [#allocation4], 1 }

</bundles_post_ra>
